<compile_context>
chip_gen: v6e
topology: v6e:2x2x1
jax: 0.10.0
libtpu: 0.0.40
codegen_flags: <defaults>
</compile_context>

<pallas_src>
import jax
import jax.numpy as jnp
from jax.experimental import pallas as pl
from jax.experimental.pallas import tpu as pltpu


OUT_DIM = 4          # classifier output classes
LANE = 128           # lane-dense padded width for the logits slab
NEG_BIG = -1e30      # "minus infinity" for max pooling


# ---------------------------------------------------------------------------
# Fused Pallas kernel: GCNConv -> global_max_pool -> 3-layer MLP
# ---------------------------------------------------------------------------

def _gcn1_fused_kernel(x_ref, adj_ref, wc_ref, bc_ref, bias_ref,
                       w1_ref, b1_ref, w2_ref, b2_ref, w3_ref, b3_ref,
                       out_ref):
    """All refs are whole-array VMEM blocks.

    x_ref    : [N, F]    bf16 node features
    adj_ref  : [N, N]    bf16 D^-1/2 (A + I) D^-1/2
    wc_ref   : [F, H]    bf16 GCNConv weight
    bc_ref   : [1, H]    f32  GCNConv bias
    bias_ref : [B, N]    f32  pooling bias: 0 for member nodes, -1e30 otherwise
    w1/b1    : [H,1024]/[1,1024]   bf16 / f32
    w2/b2    : [1024,512]/[1,512]  bf16 / f32
    w3/b3    : [512,128]/[1,128]   bf16 / f32 (zero-padded beyond col 4)
    out_ref  : [B, 128]  f32 lane-dense logits slab (cols 0..3 are real logits)
    """
    # GCNConv: h = A_hat @ (X @ W) + b   (f32 accumulation on MXU)
    xw = jnp.dot(x_ref[...], wc_ref[...], preferred_element_type=jnp.float32)
    h = jnp.dot(adj_ref[...], xw.astype(adj_ref.dtype),
                preferred_element_type=jnp.float32) + bc_ref[...]          # (N, H) f32

    # global max pool via additive membership bias (single VPU add + reduce)
    pooled = jnp.max(h[None, :, :] + bias_ref[...][:, :, None], axis=1)    # (B, H)
    # Guard: a graph with zero assigned nodes pools to ~-1e30; clamp to 0 so the
    # 1024-wide matmuls below cannot blow up.
    pooled = jnp.where(pooled < -1e20, 0.0, pooled)

    # Classification head (bf16 operands, f32 accumulation)
    p = pooled.astype(w1_ref.dtype)
    h1 = jnp.dot(p, w1_ref[...], preferred_element_type=jnp.float32) + b1_ref[...]
    h1 = jnp.maximum(h1, 0.0)
    h2 = jnp.dot(h1.astype(w2_ref.dtype), w2_ref[...],
                 preferred_element_type=jnp.float32) + b2_ref[...]
    h2 = jnp.maximum(h2, 0.0)
    out_ref[...] = jnp.dot(h2.astype(w3_ref.dtype), w3_ref[...],
                           preferred_element_type=jnp.float32) + b3_ref[...]


def _full_spec(arr):
    """Whole-array VMEM block (gridless call)."""
    return pl.BlockSpec(arr.shape, lambda: (0,) * arr.ndim)


@jax.jit
def gcn1_forward(kparams, x, adj, pool_bias):
    """Fused GCN1 forward. adj is bf16, pool_bias is f32 (both precomputed)."""
    B = pool_bias.shape[0]
    args = (x.astype(jnp.bfloat16), adj,
            kparams["conv_w"], kparams["conv_b"], pool_bias,
            kparams["w1"], kparams["b1"],
            kparams["w2"], kparams["b2"],
            kparams["w3"], kparams["b3"])
    out_padded = pl.pallas_call(
        _gcn1_fused_kernel,
        out_shape=jax.ShapeDtypeStruct((B, LANE), jnp.float32),
        in_specs=[_full_spec(a) for a in args],
        out_specs=pl.BlockSpec((B, LANE), lambda: (0, 0)),
        compiler_params=pltpu.CompilerParams(vmem_limit_bytes=16 << 20),
    )(*args)
    return out_padded[:, :OUT_DIM]


# ---------------------------------------------------------------------------
# Plain-JAX glue: parameters, adjacency normalization, pooling bias
# ---------------------------------------------------------------------------

def init_params(key, feature_dim, hidden_dim=32):
    ks = jax.random.split(key, 7)

    def dense(k, fan_in, fan_out):
        scale = 1.0 / jnp.sqrt(jnp.float32(fan_in))
        return jax.random.uniform(k, (fan_in, fan_out), jnp.float32, -scale, scale)

    return {
        "conv_w": dense(ks[0], feature_dim, hidden_dim),
        "conv_b": jnp.zeros((1, hidden_dim), jnp.float32),
        "w1": dense(ks[1], hidden_dim, 1024),
        "b1": jax.random.uniform(ks[2], (1, 1024), jnp.float32, -0.02, 0.02),
        "w2": dense(ks[3], 1024, 512),
        "b2": jax.random.uniform(ks[4], (1, 512), jnp.float32, -0.02, 0.02),
        "w3": dense(ks[5], 512, OUT_DIM),
        "b3": jax.random.uniform(ks[6], (1, OUT_DIM), jnp.float32, -0.02, 0.02),
    }


def prepare_params(params):
    """Kernel-ready params: bf16 weights, f32 biases, final layer zero-padded to
    a lane-dense 128-wide output slab."""
    w3p = jnp.zeros((params["w3"].shape[0], LANE), jnp.float32)
    w3p = w3p.at[:, :OUT_DIM].set(params["w3"])
    b3p = jnp.zeros((1, LANE), jnp.float32).at[:, :OUT_DIM].set(params["b3"])
    return {
        "conv_w": params["conv_w"].astype(jnp.bfloat16),
        "conv_b": params["conv_b"],
        "w1": params["w1"].astype(jnp.bfloat16),
        "b1": params["b1"],
        "w2": params["w2"].astype(jnp.bfloat16),
        "b2": params["b2"],
        "w3": w3p.astype(jnp.bfloat16),
        "b3": b3p,
    }


def normalized_adjacency(edge_index, num_nodes):
    """Dense D^-1/2 (A + I) D^-1/2 ; A[dst, src] = 1 per edge (PyG convention)."""
    src, dst = edge_index[0], edge_index[1]
    A = jnp.zeros((num_nodes, num_nodes), jnp.float32).at[dst, src].set(1.0)
    A = A + jnp.eye(num_nodes, dtype=jnp.float32)
    deg = jnp.sum(A, axis=1)
    d_inv_sqrt = 1.0 / jnp.sqrt(jnp.maximum(deg, 1.0))
    return A * d_inv_sqrt[:, None] * d_inv_sqrt[None, :]


def pool_bias_from_batch(batch, num_graphs):
    """[B, N] additive pooling bias: 0 where node belongs to graph b, else -1e30."""
    member = batch[None, :] == jnp.arange(num_graphs)[:, None]
    return jnp.where(member, 0.0, NEG_BIG).astype(jnp.float32)


# ---------------------------------------------------------------------------
# Main
# ---------------------------------------------------------------------------

if __name__ == "__main__":
    key = jax.random.PRNGKey(0)
    k_param, k_x, k_e = jax.random.split(key, 3)

    N = 16            # total nodes across the batch
    FEATURE_DIM = 8
    HIDDEN = 32
    NUM_GRAPHS = 2    # nodes 0..7 -> graph 0, nodes 8..15 -> graph 1
    E_PER_DIR = 20

    x = jax.random.normal(k_x, (N, FEATURE_DIM), jnp.float32)

    # Random undirected edges, kept within each graph's node range.
    k_s, k_d = jax.random.split(k_e)
    src0 = jax.random.randint(k_s, (E_PER_DIR // 2,), 0, N // 2)
    dst0 = jax.random.randint(k_d, (E_PER_DIR // 2,), 0, N // 2)
    src1 = src0 + N // 2
    dst1 = dst0 + N // 2
    src = jnp.concatenate([src0, src1, dst0, dst1])   # symmetrize
    dst = jnp.concatenate([dst0, dst1, src0, src1])
    edge_index = jnp.stack([src, dst]).astype(jnp.int32)   # [2, 40]

    batch = jnp.concatenate([
        jnp.zeros((N // 2,), jnp.int32),
        jnp.ones((N // 2,), jnp.int32),
    ])

    params = init_params(k_param, FEATURE_DIM, HIDDEN)
    kparams = prepare_params(params)

    # Static graph -> precompute adjacency + pooling bias once, outside the jit.
    adj = normalized_adjacency(edge_index, N).astype(jnp.bfloat16)
    pool_bias = pool_bias_from_batch(batch, NUM_GRAPHS)

    out = gcn1_forward(kparams, x, adj, pool_bias)
    out = jax.block_until_ready(out)
    assert out.shape == (NUM_GRAPHS, 4), out.shape
    assert jnp.all(jnp.isfinite(out))
    print("KERNEL_OK")
</pallas_src>

<mosaic_0001>
module attributes {stable_mosaic.version = 11 : i64} {
  func.func @_gcn1_fused_kernel(%arg0: memref<16x8xbf16, #tpu.memory_space<vmem>>, %arg1: memref<16x16xbf16, #tpu.memory_space<vmem>>, %arg2: memref<8x32xbf16, #tpu.memory_space<vmem>>, %arg3: memref<1x32xf32, #tpu.memory_space<vmem>>, %arg4: memref<2x16xf32, #tpu.memory_space<vmem>>, %arg5: memref<32x1024xbf16, #tpu.memory_space<vmem>>, %arg6: memref<1x1024xf32, #tpu.memory_space<vmem>>, %arg7: memref<1024x512xbf16, #tpu.memory_space<vmem>>, %arg8: memref<1x512xf32, #tpu.memory_space<vmem>>, %arg9: memref<512x128xbf16, #tpu.memory_space<vmem>>, %arg10: memref<1x128xf32, #tpu.memory_space<vmem>>, %arg11: memref<2x128xf32, #tpu.memory_space<vmem>>) attributes {dimension_semantics = [], scalar_prefetch = 0 : i64, scratch_operands = 0 : i64, tpu.core_type = #tpu.core_type<tc>} {
    %c0 = arith.constant 0 : index
    %c0_0 = arith.constant 0 : index
    %0 = vector.load %arg0[%c0, %c0_0] : memref<16x8xbf16, #tpu.memory_space<vmem>>, vector<16x8xbf16>
    %c0_1 = arith.constant 0 : index
    %c0_2 = arith.constant 0 : index
    %1 = vector.load %arg2[%c0_1, %c0_2] : memref<8x32xbf16, #tpu.memory_space<vmem>>, vector<8x32xbf16>
    %cst = arith.constant dense<0.000000e+00> : vector<16x32xf32>
    %2 = tpu.matmul %0, %1, %cst {dimension_numbers = #tpu.dot_dimension_numbers<[1], [0], [0], [1], [0, 0, 1, 1], [], []>} : vector<16x8xbf16>, vector<8x32xbf16>, vector<16x32xf32> -> vector<16x32xf32>
    %c0_3 = arith.constant 0 : index
    %c0_4 = arith.constant 0 : index
    %3 = vector.load %arg1[%c0_3, %c0_4] : memref<16x16xbf16, #tpu.memory_space<vmem>>, vector<16x16xbf16>
    %4 = arith.truncf %2 : vector<16x32xf32> to vector<16x32xbf16>
    %cst_5 = arith.constant dense<0.000000e+00> : vector<16x32xf32>
    %5 = tpu.matmul %3, %4, %cst_5 {dimension_numbers = #tpu.dot_dimension_numbers<[1], [0], [0], [1], [0, 0, 1, 1], [], []>} : vector<16x16xbf16>, vector<16x32xbf16>, vector<16x32xf32> -> vector<16x32xf32>
    %c0_6 = arith.constant 0 : index
    %c0_7 = arith.constant 0 : index
    %6 = vector.load %arg3[%c0_6, %c0_7] : memref<1x32xf32, #tpu.memory_space<vmem>>, vector<1x32xf32>
    %7 = vector.broadcast %6 : vector<1x32xf32> to vector<16x32xf32>
    %8 = arith.addf %5, %7 : vector<16x32xf32>
    %9 = vector.shape_cast %8 : vector<16x32xf32> to vector<1x16x32xf32>
    %c0_8 = arith.constant 0 : index
    %c0_9 = arith.constant 0 : index
    %10 = vector.load %arg4[%c0_8, %c0_9] : memref<2x16xf32, #tpu.memory_space<vmem>>, vector<2x16xf32>
    %11 = vector.shape_cast %10 : vector<2x16xf32> to vector<2x16x1xf32>
    %12 = vector.broadcast %9 : vector<1x16x32xf32> to vector<2x16x32xf32>
    %13 = vector.broadcast %11 : vector<2x16x1xf32> to vector<2x16x32xf32>
    %14 = arith.addf %12, %13 : vector<2x16x32xf32>
    %cst_10 = arith.constant dense<0xFF800000> : vector<2x32xf32>
    %15 = vector.multi_reduction <maximumf>, %14, %cst_10 [1] : vector<2x16x32xf32> to vector<2x32xf32>
    %cst_11 = arith.constant -1.000000e+20 : f32
    %16 = vector.broadcast %cst_11 : f32 to vector<2x32xf32>
    %17 = arith.cmpf olt, %15, %16 : vector<2x32xf32>
    %cst_12 = arith.constant 0.000000e+00 : f32
    %18 = vector.broadcast %cst_12 : f32 to vector<2x32xf32>
    %19 = arith.select %17, %18, %15 : vector<2x32xi1>, vector<2x32xf32>
    %20 = arith.truncf %19 : vector<2x32xf32> to vector<2x32xbf16>
    %c0_13 = arith.constant 0 : index
    %c0_14 = arith.constant 0 : index
    %21 = vector.load %arg5[%c0_13, %c0_14] : memref<32x1024xbf16, #tpu.memory_space<vmem>>, vector<32x1024xbf16>
    %cst_15 = arith.constant dense<0.000000e+00> : vector<2x1024xf32>
    %22 = tpu.matmul %20, %21, %cst_15 {dimension_numbers = #tpu.dot_dimension_numbers<[1], [0], [0], [1], [0, 0, 1, 1], [], []>} : vector<2x32xbf16>, vector<32x1024xbf16>, vector<2x1024xf32> -> vector<2x1024xf32>
    %c0_16 = arith.constant 0 : index
    %c0_17 = arith.constant 0 : index
    %23 = vector.load %arg6[%c0_16, %c0_17] : memref<1x1024xf32, #tpu.memory_space<vmem>>, vector<1x1024xf32>
    %24 = vector.broadcast %23 : vector<1x1024xf32> to vector<2x1024xf32>
    %25 = arith.addf %22, %24 : vector<2x1024xf32>
    %cst_18 = arith.constant 0.000000e+00 : f32
    %26 = vector.broadcast %cst_18 : f32 to vector<2x1024xf32>
    %27 = arith.maximumf %25, %26 : vector<2x1024xf32>
    %28 = arith.truncf %27 : vector<2x1024xf32> to vector<2x1024xbf16>
    %c0_19 = arith.constant 0 : index
    %c0_20 = arith.constant 0 : index
    %29 = vector.load %arg7[%c0_19, %c0_20] : memref<1024x512xbf16, #tpu.memory_space<vmem>>, vector<1024x512xbf16>
    %cst_21 = arith.constant dense<0.000000e+00> : vector<2x512xf32>
    %30 = tpu.matmul %28, %29, %cst_21 {dimension_numbers = #tpu.dot_dimension_numbers<[1], [0], [0], [1], [0, 0, 1, 1], [], []>} : vector<2x1024xbf16>, vector<1024x512xbf16>, vector<2x512xf32> -> vector<2x512xf32>
    %c0_22 = arith.constant 0 : index
    %c0_23 = arith.constant 0 : index
    %31 = vector.load %arg8[%c0_22, %c0_23] : memref<1x512xf32, #tpu.memory_space<vmem>>, vector<1x512xf32>
    %32 = vector.broadcast %31 : vector<1x512xf32> to vector<2x512xf32>
    %33 = arith.addf %30, %32 : vector<2x512xf32>
    %cst_24 = arith.constant 0.000000e+00 : f32
    %34 = vector.broadcast %cst_24 : f32 to vector<2x512xf32>
    %35 = arith.maximumf %33, %34 : vector<2x512xf32>
    %36 = arith.truncf %35 : vector<2x512xf32> to vector<2x512xbf16>
    %c0_25 = arith.constant 0 : index
    %c0_26 = arith.constant 0 : index
    %37 = vector.load %arg9[%c0_25, %c0_26] : memref<512x128xbf16, #tpu.memory_space<vmem>>, vector<512x128xbf16>
    %cst_27 = arith.constant dense<0.000000e+00> : vector<2x128xf32>
    %38 = tpu.matmul %36, %37, %cst_27 {dimension_numbers = #tpu.dot_dimension_numbers<[1], [0], [0], [1], [0, 0, 1, 1], [], []>} : vector<2x512xbf16>, vector<512x128xbf16>, vector<2x128xf32> -> vector<2x128xf32>
    %c0_28 = arith.constant 0 : index
    %c0_29 = arith.constant 0 : index
    %39 = vector.load %arg10[%c0_28, %c0_29] : memref<1x128xf32, #tpu.memory_space<vmem>>, vector<1x128xf32>
    %40 = vector.broadcast %39 : vector<1x128xf32> to vector<2x128xf32>
    %41 = arith.addf %38, %40 : vector<2x128xf32>
    %c0_30 = arith.constant 0 : index
    %c0_31 = arith.constant 0 : index
    %42 = vector.load %arg11[%c0_30, %c0_31] : memref<2x128xf32, #tpu.memory_space<vmem>>, vector<2x128xf32>
    tpu.vector_store %arg11[%c0_30, %c0_31], %41 {strides = array<i32>} : memref<2x128xf32, #tpu.memory_space<vmem>>, vector<2x128xf32>,
    return
  }
}

</mosaic_0001>

<bundles_post_ra>
// kernel: gcn1_forward.1
= control target key start
LH: loop header
LB: loop body
LE: loop exit
PB: predicated region body
PF: predicated region fallthrough
CT: control target
= control target key end

     0   :  { %16 = vsyncpa [#allocation3], 0  ;;  %s3969_s0 = inlined_call_operand.vmem [shape: bf16[16,8], index: 0, kind: input, shape index: {}]   ;;  %s3970_s1 = inlined_call_operand.vmem [shape: bf16[16,16], index: 1, kind: input, shape index: {}]   ;;  %s3971_s2 = inlined_call_operand.vmem [shape: bf16[8,32], index: 2, kind: input, shape index: {}]   ;;  %s3972_s3 = inlined_call_operand.vmem [shape: f32[1,32], index: 3, kind: input, shape index: {}]   ;;  %s3973_s4 = inlined_call_operand.vmem [shape: f32[2,16], index: 4, kind: input, shape index: {}]   ;;  %s3974_s5 = inlined_call_operand.hbm [shape: bf16[32,1024], index: 5, kind: input, shape index: {}]   ;;  %s3975_s6 = inlined_call_operand.vmem [shape: f32[1,1024], index: 6, kind: input, shape index: {}]   ;;  %s3976_s7 = inlined_call_operand.hbm [shape: bf16[1024,512], index: 7, kind: input, shape index: {}]   ;;  %s3977_s8 = inlined_call_operand.vmem [shape: f32[1,512], index: 8, kind: input, shape index: {}]   ;;  %s3978_s9 = inlined_call_operand.hbm [shape: bf16[512,128], index: 9, kind: input, shape index: {}]   ;;  %s3979_s10 = inlined_call_operand.hbm [shape: f32[1,128], index: 10, kind: input, shape index: {}]   ;;  %s3980_s11 = inlined_call_operand.hbm [shape: f32[2,128], index: 11, kind: output, shape index: {}]  }
   0x1   :  { %17 = vsyncpa [#allocation6], 0 }
   0x2   :  { %18 = vsyncpa [#allocation9], 0 }
   0x3   :  { %19 = vsyncpa [#allocation4], 0  ;;  %s3759_s17 = smov [#allocation5]  }
   0x4   :  { %s49_s18 = sshll.u32 %s3759_s17, 4  ;;  %s50_s18 = int_to_ptr.vmem [resolvable:$true] %s49_s18 }
   0x5   :  { %s3659_s19 = scalar_lea.vmem %s50_s18, 32768  ;;  %p3664_p1 = scmp.lt.s32.totalorder %s50_s18, %s50_s18 }
   0x6   :  { %p3660_p0 = scmp.ne.s32.totalorder %s50_s18, %s3659_s19  ;;  %p3665_p2 = scmp.lt.s32.totalorder %s3659_s19, %s3659_s19 }
   0x8   :  { %p3666_p3 = por %p3665_p2, %p3664_p1 }
   0xa   :  { %p3667_p4 = pnand %p3666_p3, %p3660_p0 }
   0xc   :  { %3670 = shalt.err (!%p3667_p4)
}
   0xd   :  { %s3760_s20 = smov 256   ;;  %s3761_s21 = smov 16  }
   0xe   :  { %55 = dma.hbm_to_vmem [thread:$0]  %s3976_s7, 32768, %s50_s18, [#allocation6], %s3760_s20, %s3760_s20, %s3761_s21  }
   0xf   :  { %s3762_s24 = smov [#allocation2]  }
  0x10   :  { %s35_s25 = sshll.u32 %s3762_s24, 4  ;;  %s36_s25 = int_to_ptr.vmem [resolvable:$true] %s35_s25 }
  0x11   :  { %s3679_s26 = scalar_lea.vmem %s36_s25, 2048  ;;  %p3684_p6 = scmp.lt.s32.totalorder %s36_s25, %s36_s25 }
  0x12   :  { %p3680_p5 = scmp.ne.s32.totalorder %s36_s25, %s3679_s26  ;;  %p3685_p7 = scmp.lt.s32.totalorder %s3679_s26, %s3679_s26 }
  0x14   :  { %p3686_p8 = por %p3685_p7, %p3684_p6 }
  0x16   :  { %p3687_p9 = pnand %p3686_p8, %p3680_p5 }
  0x18   :  { %3690 = shalt.err (!%p3687_p9)
}
  0x19   :  { %s3763_s27 = smov 512   ;;  %s3764_s28 = smov 32  }
  0x1a   :  { %41 = dma.hbm_to_vmem [thread:$0]  %s3974_s5, 2048, %s36_s25, [#allocation3], %s3763_s27, %s3763_s27, %s3764_s28  }
  0x1b   :  { %s3765_s12 = smov [#allocation7]  }
  0x1c   :  { %s63_s13 = sshll.u32 %s3765_s12, 4  ;;  %s64_s13 = int_to_ptr.vmem [resolvable:$true] %s63_s13 }
  0x1d   :  { %s3699_s7 = scalar_lea.vmem %s64_s13, 4096  ;;  %p3704_p11 = scmp.lt.s32.totalorder %s64_s13, %s64_s13 }
  0x1e   :  { %p3700_p10 = scmp.ne.s32.totalorder %s64_s13, %s3699_s7  ;;  %p3705_p12 = scmp.lt.s32.totalorder %s3699_s7, %s3699_s7 }
  0x20   :  { %p3706_p13 = por %p3705_p12, %p3704_p11 }
  0x22   :  { %p3707_p0 = pnand %p3706_p13, %p3700_p10 }
  0x24   :  { %3710 = shalt.err (!%p3707_p0)
}
  0x25   :  { %s3766_s14 = smov 64   ;;  %s3767_s15 = smov 4  }
  0x26   :  { %69 = dma.hbm_to_vmem [thread:$0]  %s3978_s9, 4096, %s64_s13, [#allocation6], %s3766_s14, %s3766_s14, %s3767_s15  }
  0x27   :  { %s3768_s18 = smov [#allocation8]  }
  0x28   :  { %s76_s19 = sshll.u32 %s3768_s18, 4  ;;  %s77_s19 = int_to_ptr.vmem [resolvable:$true] %s76_s19 }
  0x29   :  { %s3719_s5 = scalar_lea.vmem %s77_s19, 16  ;;  %s3723_s20 = scalar_lea.vmem %s77_s19, 32 }
  0x2a   :  { %p3720_p1 = scmp.ne.s32.totalorder %s77_s19, %s3719_s5  ;;  %p3724_p2 = scmp.lt.s32.totalorder %s77_s19, %s77_s19 }
  0x2b   :  { %p3725_p3 = scmp.lt.s32.totalorder %s3723_s20, %s3719_s5 }
  0x2d   :  { %p3726_p4 = por %p3725_p3, %p3724_p2 }
  0x2f   :  { %p3727_p5 = pnand %p3726_p4, %p3720_p1 }
  0x31   :  { %3730 = shalt.err (!%p3727_p5)
}
  0x32   :  { %79 = dma.hbm_to_vmem [thread:$0]  %s3979_s10, 16, %s77_s19, [#allocation9]  }
  0x33   :  { %3751 = dma.done.wait [#allocation3], 2048  }
  0x34   :  { %3752 = vsyncadd [#allocation3], 4294965248 }
  0x35   :  { %3753 = dma.done.wait [#allocation6], 36864  }
  0x36   :  { %3754 = vsyncadd [#allocation6], 4294930432 }
  0x37   :  { %3755 = dma.done.wait [#allocation9], 16  }
  0x38   :  { %3756 = vsyncadd [#allocation9], 4294967280  ;;  %v3769_v0 = vmov 0.0   ;;  %vm3770_vm0 = vmmov 0   ;;  %vm105_vm1 = vcmask 1043456   ;;  %v3233_v3 = vld [vmem:[%s3969_s0] sm:$0xff]   ;;  %v211_v4 = vlaneseq }
  0x39   :  { %3207 = vmatprep.subr.bf16.mxu0 %v3769_v0  ;;  %3209 = vmatprep.mubr.msk.bf16.mxu0 %vm3770_vm0, %v3769_v0  ;;  %v95_v1 = vld [vmem:[%s3971_s2] sm:$0xf]  ;;  %vm101_vm2 = vcmask 64512   ;;  %vm165_vm3 = vcmask 130048   ;;  %v271_v19 = vld [vmem:[#allocation2 + $0x48] sm:$0xff]  ;;  %v3771_v33 = vmov 0  }
  0x3a   :  { %3213 = vmatprep.subr.bf16.mxu1 %v3769_v0  ;;  %3215 = vmatprep.mubr.msk.bf16.mxu1 %vm3770_vm0, %v3769_v0  ;;  %v107_v2 = vsel %vm105_vm1, %v95_v1, 0  ;;  %v210_v5 = vld [vmem:[%s3973_s4] sm:$0x3]  ;;  %v3854_v6 = vshrl.u32 %v211_v4, 7  ;;  %v275_v21 = vld [vmem:[#allocation2 + $0x68] sm:$0xff]  ;;  %v3868_v34 = vld [vmem:[#allocation2 + $0x50] sm:$0xff] }
  0x3b   :  { %3208 = vmatpush3.bf16.msra.mxu0 %v107_v2  ;;  %v3234_v16 = vld [vmem:[%s3970_s1] sm:$0xff]   ;;  %v2860_v23 = vcombine.low %v271_v19, %v275_v21  ;;  %v2861_v24 = vcombine.high %v271_v19, %v275_v21  ;;  %v263_v27 = vld [vmem:[#allocation2 + $0x8] sm:$0xff]  ;;  %v3870_v35 = vld [vmem:[#allocation2 + $0x70] sm:$0xff]  ;;  %vm237_vm4 = vcmask 261120   ;;  %vm324_vm7 = vcmask 1041409  }
  0x3c   :  { %v3857_v7 = vsub.s32 1, %v3854_v6  ;;  %v3860_v8 = vsub.s32 0, %v3854_v6  ;;  %v270_v17 = vld [vmem:[#allocation2 + $0x40] sm:$0xff]  ;;  %v267_v29 = vld [vmem:[#allocation2 + $0x28] sm:$0xff]  ;;  %v3872_v36 = vld [vmem:[#allocation2 + $0x58] sm:$0xff]  ;;  %v2863_v37 = vcombine.high %v3868_v34, %v3870_v35  ;;  %v2862_v39 = vcombine.low %v3868_v34, %v3870_v35 }
  0x3d   :  { %v274_v18 = vld [vmem:[#allocation2 + $0x60] sm:$0xff]  ;;  %v2852_v31 = vcombine.low %v263_v27, %v267_v29  ;;  %v2853_v32 = vcombine.high %v263_v27, %v267_v29  ;;  %v277_v38 = vld [vmem:[#allocation2 + $0x78] sm:$0xff]  ;;  %v268_v21 = vld [vmem:[#allocation2 + $0x30] sm:$0xff] }
  0x3e   :  { %3210 = vmatmul.mubr.msk.bf16.vlgmr.msra.gmra.mxu0 %vm101_vm2, %v3233_v3  ;;  %v225_v9 = vrot.slane %v210_v5, %v3857_v7  ;;  %v214_v10 = vrot.slane %v210_v5, %v3860_v8  ;;  %v2859_v20 = vcombine.high %v270_v17, %v274_v18  ;;  %v2858_v22 = vcombine.low %v270_v17, %v274_v18  ;;  %v262_v25 = vld [vmem:[#allocation2] sm:$0xff]  ;;  %v264_v18 = vld [vmem:[#allocation2 + $0x10] sm:$0xff] }
  0x3f   :  { %v266_v26 = vld [vmem:[#allocation2 + $0x20] sm:$0xff]  ;;  %442 = vmatprep.mubr.bf16.mxu0 %v3771_v33  ;;  %v2864_v40 = vcombine.low %v3872_v36, %v277_v38  ;;  %v2865_v41 = vcombine.high %v3872_v36, %v277_v38 }
  0x40   :  { %227 = vbcast.lane.b32.xlu1 %v225_v9, 256  ;;  %216 = vbcast.lane.b32.xlu0 %v214_v10, 256  ;;  %v2851_v28 = vcombine.high %v262_v25, %v266_v26  ;;  %v2850_v30 = vcombine.low %v262_v25, %v266_v26  ;;  %v2847_v43 = vld [vmem:[%s3972_s3] ss:$0 sm:$0xff]  ;;  %v2855_v26 = vcombine.high %v264_v18, %v268_v21  ;;  %v3243_v35 = vld [vmem:[#allocation5 + $0xc4] ss:$16 sps:$4 sm:$0xff]  }
  0x41   :  { %422 = vmatprep.subr.bf16.mxu0 %v2859_v20  ;;  %v3238_v34 = vld [vmem:[#allocation5 + $0x2e0] ss:$16 sps:$4 sm:$0xff]   ;;  %v3246_v36 = vld [vmem:[#allocation5 + $0x2c4] ss:$16 sps:$4 sm:$0xff]  }
  0x42   :  { %423 = vmatpush1.bf16.msra.mxu0 %v2858_v22  ;;  %v265_v22 = vld [vmem:[#allocation2 + $0x18] sm:$0xff]  ;;  %v3244_v38 = vld [vmem:[#allocation5 + $0x2c0] ss:$16 sps:$4 sm:$0xff]  }
  0x43   :  { %424 = vmatprep.subr.bf16.mxu0 %v2851_v28  ;;  %v2854_v28 = vcombine.low %v264_v18, %v268_v21  ;;  %v3312_v18 = vld [vmem:[#allocation5 + $0x364] ss:$16 sps:$4 sm:$0xff]  }
  0x44   :  { %231 = vbcast.lane.b32.xlu1 %v225_v9, 264  ;;  %220 = vbcast.lane.b32.xlu0 %v214_v10, 264  ;;  %v3315_v21 = vld [vmem:[#allocation5 + $0x144] ss:$16 sps:$4 sm:$0xff]  }
  0x46   :  { %425 = vmatpush1.bf16.msra.mxu0 %v2850_v30  ;;  %v3237_v30 = vld [vmem:[#allocation5 + $0xe4] ss:$16 sps:$4 sm:$0xff]  }
  0x47   :  { %504 = vmatprep.subr.bf16.mxu0 %v2863_v37  ;;  %v3241_v37 = vld [vmem:[#allocation5 + $0xc0] ss:$16 sps:$4 sm:$0xff]  }
  0xb2   :  { %v228_v42 = vpop.permute.xlu1 %227  ;;  %v217_v44 = vpop.permute.xlu0 %216 }
  0xb6   :  { %v232_v48 = vpop.permute.xlu1 %231  ;;  %v221_v50 = vpop.permute.xlu0 %220 }
  0xfe   :  { %v143_v11 = vpop.f32.mrf.mxu0 }
 0x100   :  { %v3211_v12 = vpop.f32.mrf.mxu0 }
 0x102   :  { %v146_v13 = vpop.f32.mrf.mxu0 }
 0x103   :  { %v152_v14 = vpack.c.bf16 %v146_v13, %v143_v11 }
 0x104   :  { %v3212_v15 = vpop.f32.mrf.mxu0 }
 0x105   :  { %3214 = vmatpush3.bf16.msra.mxu1 %v152_v14 }
 0x106   :  { %463 = vmatprep.subr.bf16.mxu1 %v2861_v24 }
 0x108   :  { %3216 = vmatmul.mubr.msk.bf16.vlgmr.msra.gmra.mxu1 %vm165_vm3, %v3234_v16 }
 0x109   :  { %464 = vmatpush1.bf16.msra.mxu1 %v2860_v23  ;;  %483 = vmatprep.mubr.bf16.mxu1 %v3771_v33  ;;  %v269_v23 = vld [vmem:[#allocation2 + $0x38] sm:$0xff] }
 0x10a   :  { %465 = vmatprep.subr.bf16.mxu1 %v2853_v32  ;;  %v2857_v27 = vcombine.high %v265_v22, %v269_v23  ;;  %v2856_v29 = vcombine.low %v265_v22, %v269_v23  ;;  %v3235_v32 = vld [vmem:[#allocation5 + $0xe0] ss:$16 sps:$4 sm:$0xff]   ;;  %v3318_v22 = vld [vmem:[#allocation5 + $0x344] ss:$16 sps:$4 sm:$0xff]  }
 0x10b   :  { %v3313_v23 = vld [vmem:[#allocation5 + $0x140] ss:$16 sps:$4 sm:$0xff]  }
 0x10d   :  { %466 = vmatpush1.bf16.msra.mxu1 %v2852_v31  ;;  %v3240_v31 = vld [vmem:[#allocation5 + $0x2e4] ss:$16 sps:$4 sm:$0xff]  }
 0x10e   :  { %545 = vmatprep.subr.bf16.mxu1 %v2865_v41  ;;  %v3250_v41 = vld [vmem:[#allocation5 + $0x2a0] ss:$16 sps:$4 sm:$0xff]  }
 0x1c8   :  { %v203_v45 = vpop.f32.mrf.mxu1 }
 0x1c9   :  { %v204_v46 = vadd.f32 %v2847_v43, %v203_v45  ;;  %v3256_v45 = vld [vmem:[#allocation5 + $0x280] ss:$16 sps:$4 sm:$0xff]  }
 0x1ca   :  { %v3217_v47 = vpop.f32.mrf.mxu1 }
 0x1cb   :  { %v235_v51 = vadd.f32 %v228_v42, %v204_v46  ;;  %v233_v52 = vadd.f32 %v217_v44, %v204_v46  ;;  %v3255_v42 = vld [vmem:[#allocation5 + $0x84] ss:$16 sps:$4 sm:$0xff]   ;;  %v3253_v44 = vld [vmem:[#allocation5 + $0x80] ss:$16 sps:$4 sm:$0xff]  }
 0x1cc   :  { %v206_v49 = vpop.f32.mrf.mxu1  ;;  %v3261_v46 = vld [vmem:[#allocation5 + $0x64] ss:$16 sps:$4 sm:$0xff]  }
 0x1cd   :  { %v207_v53 = vadd.f32 %v2847_v43, %v206_v49  ;;  %v247_v57 = vsel %vm237_vm4, %v235_v51, -inf  ;;  %v238_v58 = vsel %vm237_vm4, %v233_v52, -inf  ;;  %v3258_v43 = vld [vmem:[#allocation5 + $0x284] ss:$16 sps:$4 sm:$0xff]   ;;  %v3262_v49 = vld [vmem:[#allocation5 + $0x260] ss:$16 sps:$4 sm:$0xff]  }
 0x1ce   :  { %v3218_v54 = vpop.f32.mrf.mxu1  ;;  %v3264_v47 = vld [vmem:[#allocation5 + $0x264] ss:$16 sps:$4 sm:$0xff]   ;;  %v3265_v52 = vld [vmem:[#allocation5 + $0x40] ss:$16 sps:$4 sm:$0xff]  }
 0x1cf   :  { %v236_v55 = vadd.f32 %v232_v48, %v207_v53  ;;  %v234_v56 = vadd.f32 %v221_v50, %v207_v53  ;;  %v3259_v48 = vld [vmem:[#allocation5 + $0x60] ss:$16 sps:$4 sm:$0xff]   ;;  %v3267_v50 = vld [vmem:[#allocation5 + $0x44] ss:$16 sps:$4 sm:$0xff]  }
 0x1d0   :  { %v3270_v51 = vld [vmem:[#allocation5 + $0x244] ss:$16 sps:$4 sm:$0xff]   ;;  %v3268_v53 = vld [vmem:[#allocation5 + $0x240] ss:$16 sps:$4 sm:$0xff]  }
 0x1d1   :  { %v248_v59 = vsel %vm237_vm4, %v236_v55, -inf  ;;  %v239_v60 = vsel %vm237_vm4, %v234_v56, -inf  ;;  %v3273_v54 = vld [vmem:[#allocation5 + $0x24] ss:$16 sps:$4 sm:$0xff]   ;;  %v3271_v56 = vld [vmem:[#allocation5 + $0x20] ss:$16 sps:$4 sm:$0xff]  }
 0x1d2   :  { %v249_v61 = vmax.f32 %v247_v57, %v248_v59  ;;  %v240_v62 = vmax.f32 %v238_v58, %v239_v60  ;;  %v3276_v55 = vld [vmem:[#allocation5 + $0x224] ss:$16 sps:$4 sm:$0xff]   ;;  %v3274_v57 = vld [vmem:[#allocation5 + $0x220] ss:$16 sps:$4 sm:$0xff]  }
 0x1d3   :  { %v3279_v58 = vld [vmem:[#allocation5 + $0x4] ss:$16 sps:$4 sm:$0xff]   ;;  %v3277_v60 = vld [vmem:[#allocation5] ss:$16 sps:$4 sm:$0xff]  }
 0x1d4   :  { %v250_v63 = vrot.slane %v249_v61, 4  ;;  %v241_v0 = vrot.slane %v240_v62, 4  ;;  %v3282_v59 = vld [vmem:[#allocation5 + $0x204] ss:$16 sps:$4 sm:$0xff]  }
 0x1d6   :  { %v251_v1 = vmax.f32 %v249_v61, %v250_v63  ;;  %v242_v2 = vmax.f32 %v240_v62, %v241_v0  ;;  %v3280_v61 = vld [vmem:[#allocation5 + $0x200] ss:$16 sps:$4 sm:$0xff]   ;;  %v3285_v62 = vld [vmem:[#allocation5 + $0x1e4] ss:$16 sps:$4 sm:$0xff]  }
 0x1d7   :  { %v3288_v63 = vld [vmem:[#allocation5 + $0x3e4] ss:$16 sps:$4 sm:$0xff]   ;;  %v3283_v0 = vld [vmem:[#allocation5 + $0x1e0] ss:$16 sps:$4 sm:$0xff]  }
 0x1d8   :  { %v252_v3 = vrot.slane %v251_v1, 2  ;;  %v243_v4 = vrot.slane %v242_v2, 2 }
 0x1da   :  { %v253_v5 = vmax.f32 %v251_v1, %v252_v3  ;;  %v244_v9 = vmax.f32 %v242_v2, %v243_v4  ;;  %v3286_v1 = vld [vmem:[#allocation5 + $0x3e0] ss:$16 sps:$4 sm:$0xff]   ;;  %v3291_v2 = vld [vmem:[#allocation5 + $0x1c4] ss:$16 sps:$4 sm:$0xff]  }
 0x1db   :  { %v3294_v3 = vld [vmem:[#allocation5 + $0x3c4] ss:$16 sps:$4 sm:$0xff]   ;;  %v3289_v4 = vld [vmem:[#allocation5 + $0x1c0] ss:$16 sps:$4 sm:$0xff]  }
 0x1dc   :  { %v254_v10 = vrot.slane %v253_v5, 1  ;;  %v245_v11 = vrot.slane %v244_v9, 1 }
 0x1de   :  { %v255_v12 = vmax.f32 %v253_v5, %v254_v10  ;;  %v246_v13 = vmax.f32 %v244_v9, %v245_v11  ;;  %v3292_v5 = vld [vmem:[#allocation5 + $0x3c0] ss:$16 sps:$4 sm:$0xff]   ;;  %v3297_v9 = vld [vmem:[#allocation5 + $0x1a4] ss:$16 sps:$4 sm:$0xff]  }
 0x1df   :  { %v3300_v10 = vld [vmem:[#allocation5 + $0x3a4] ss:$16 sps:$4 sm:$0xff]   ;;  %v3295_v11 = vld [vmem:[#allocation5 + $0x1a0] ss:$16 sps:$4 sm:$0xff]  }
 0x1e0   :  { %vm257_vm5 = vcmp.lt.f32.partialorder %v255_v12, -1e+20  ;;  %vm256_vm6 = vcmp.lt.f32.partialorder %v246_v13, -1e+20 }
 0x1e1   :  { %v259_v14 = vsel %vm257_vm5, 0.0, %v255_v12  ;;  %v258_v15 = vsel %vm256_vm6, 0.0, %v246_v13  ;;  %v3298_v12 = vld [vmem:[#allocation5 + $0x3a0] ss:$16 sps:$4 sm:$0xff]   ;;  %v3303_v13 = vld [vmem:[#allocation5 + $0x184] ss:$16 sps:$4 sm:$0xff]  }
 0x1e2   :  { %v261_v16 = vpack.c.bf16 %v259_v14, %v259_v14  ;;  %v260_v17 = vpack.c.bf16 %v258_v15, %v258_v15  ;;  %v3306_v14 = vld [vmem:[#allocation5 + $0x384] ss:$16 sps:$4 sm:$0xff]   ;;  %v3301_v15 = vld [vmem:[#allocation5 + $0x180] ss:$16 sps:$4 sm:$0xff]  }
 0x1e4   :  { %v323_v19 = vunpack.c.l.b16 %v261_v16  ;;  %v322_v20 = vunpack.c.l.b16 %v260_v17  ;;  %v3304_v16 = vld [vmem:[#allocation5 + $0x380] ss:$16 sps:$4 sm:$0xff]   ;;  %v3309_v17 = vld [vmem:[#allocation5 + $0x164] ss:$16 sps:$4 sm:$0xff]  }
 0x1e6   :  { %v325_v24 = vsel %vm324_vm7, %v323_v19, %v322_v20  ;;  %v3307_v19 = vld [vmem:[#allocation5 + $0x160] ss:$16 sps:$4 sm:$0xff]  }
 0x1e7   :  { %v326_v25 = vpack.c.b16 %v325_v24, %v325_v24  ;;  %v3310_v20 = vld [vmem:[#allocation5 + $0x360] ss:$16 sps:$4 sm:$0xff]  }
 0x1e8   :  { %v3316_v24 = vld [vmem:[#allocation5 + $0x340] ss:$16 sps:$4 sm:$0xff]  }
 0x1e9   :  { %2866 = vmatmul.mubr.msk.bf16.vlgmr.msra.gmra.mxu0 %vm237_vm4, %v326_v25  ;;  %2867 = vmatmul.mubr.msk.bf16.vlgmr.msra.gmra.mxu1 %vm237_vm4, %v326_v25 }
 0x1ea   :  { %505 = vmatpush1.bf16.msra.mxu0 %v2862_v39  ;;  %546 = vmatpush1.bf16.msra.mxu1 %v2864_v40  ;;  %v3249_v39 = vld [vmem:[#allocation5 + $0xa4] ss:$16 sps:$4 sm:$0xff]   ;;  %v3247_v40 = vld [vmem:[#allocation5 + $0xa0] ss:$16 sps:$4 sm:$0xff]  }
 0x1eb   :  { %506 = vmatprep.subr.bf16.mxu0 %v2855_v26  ;;  %547 = vmatprep.subr.bf16.mxu1 %v2857_v27  ;;  %v3324_v26 = vld [vmem:[#allocation5 + $0x324] ss:$16 sps:$4 sm:$0xff]   ;;  %v3319_v27 = vld [vmem:[#allocation5 + $0x120] ss:$16 sps:$4 sm:$0xff]  }
 0x1ec   :  { %524 = vmatprep.mubr.bf16.mxu0 %v3771_v33  ;;  %565 = vmatprep.mubr.bf16.mxu1 %v3771_v33  ;;  %v3252_v33 = vld [vmem:[#allocation5 + $0x2a4] ss:$16 sps:$4 sm:$0xff]  }
 0x1ee   :  { %507 = vmatpush1.bf16.msra.mxu0 %v2854_v28  ;;  %548 = vmatpush1.bf16.msra.mxu1 %v2856_v29  ;;  %v3322_v28 = vld [vmem:[#allocation5 + $0x320] ss:$16 sps:$4 sm:$0xff]   ;;  %v3327_v29 = vld [vmem:[#allocation5 + $0x104] ss:$16 sps:$4 sm:$0xff]  }
 0x1ef   :  { %2148 = vmatprep.subr.bf16.mxu0 %v3237_v30  ;;  %2189 = vmatprep.subr.bf16.mxu1 %v3240_v31  ;;  %v3330_v30 = vld [vmem:[#allocation5 + $0x304] ss:$16 sps:$4 sm:$0xff]   ;;  %v3325_v31 = vld [vmem:[#allocation5 + $0x100] ss:$16 sps:$4 sm:$0xff]  }
 0x1f1   :  { %2868 = vmatmul.mubr.msk.bf16.vlgmr.msra.gmra.mxu0 %vm237_vm4, %v326_v25  ;;  %2869 = vmatmul.mubr.msk.bf16.vlgmr.msra.gmra.mxu1 %vm237_vm4, %v326_v25  ;;  %v3321_v25 = vld [vmem:[#allocation5 + $0x124] ss:$16 sps:$4 sm:$0xff]  }
 0x1f2   :  { %2149 = vmatpush1.bf16.msra.mxu0 %v3235_v32  ;;  %2190 = vmatpush1.bf16.msra.mxu1 %v3238_v34  ;;  %v3328_v32 = vld [vmem:[#allocation5 + $0x300] ss:$16 sps:$4 sm:$0xff]   ;;  %v3333_v34 = vld [vmem:[#allocation5 + $0x4e4] ss:$16 sps:$4 sm:$0xff]  }
 0x1f3   :  { %2150 = vmatprep.subr.bf16.mxu0 %v3243_v35  ;;  %2191 = vmatprep.subr.bf16.mxu1 %v3246_v36  ;;  %v3336_v35 = vld [vmem:[#allocation5 + $0x6e4] ss:$16 sps:$4 sm:$0xff]   ;;  %v290_v36 = vsub.s32 2, %v3854_v6 }
 0x1f6   :  { %2151 = vmatpush1.bf16.msra.mxu0 %v3241_v37  ;;  %2192 = vmatpush1.bf16.msra.mxu1 %v3244_v38  ;;  %v3898_v37 = vld [vmem:[%s3975_s6] sm:$0xff]  ;;  %v294_v38 = vsub.s32 3, %v3854_v6 }
 0x1f7   :  { %2152 = vmatprep.subr.bf16.mxu0 %v3249_v39  ;;  %2193 = vmatprep.subr.bf16.mxu1 %v3252_v33  ;;  %v283_v39 = vrot.slane %v3898_v37, %v3860_v8  ;;  %v291_v33 = vrot.slane %v3898_v37, %v290_v36 }
 0x1fa   :  { %2153 = vmatpush1.bf16.msra.mxu0 %v3247_v40  ;;  %2194 = vmatpush1.bf16.msra.mxu1 %v3250_v41  ;;  %v287_v40 = vrot.slane %v3898_v37, %v3857_v7  ;;  %v295_v41 = vrot.slane %v3898_v37, %v294_v38 }
 0x1fb   :  { %2154 = vmatprep.subr.bf16.mxu0 %v3255_v42  ;;  %2195 = vmatprep.subr.bf16.mxu1 %v3258_v43 }
 0x1fe   :  { %2155 = vmatpush1.bf16.msra.mxu0 %v3253_v44  ;;  %2196 = vmatpush1.bf16.msra.mxu1 %v3256_v45 }
 0x1ff   :  { %2156 = vmatprep.subr.bf16.mxu0 %v3261_v46  ;;  %2197 = vmatprep.subr.bf16.mxu1 %v3264_v47 }
 0x202   :  { %2157 = vmatpush1.bf16.msra.mxu0 %v3259_v48  ;;  %2198 = vmatpush1.bf16.msra.mxu1 %v3262_v49 }
 0x203   :  { %2158 = vmatprep.subr.bf16.mxu0 %v3267_v50  ;;  %2199 = vmatprep.subr.bf16.mxu1 %v3270_v51  ;;  %v302_v50 = vsub.s32 5, %v3854_v6  ;;  %v310_v51 = vsub.s32 7, %v3854_v6 }
 0x206   :  { %2159 = vmatpush1.bf16.msra.mxu0 %v3265_v52  ;;  %2200 = vmatpush1.bf16.msra.mxu1 %v3268_v53 }
 0x207   :  { %2160 = vmatprep.subr.bf16.mxu0 %v3273_v54  ;;  %2201 = vmatprep.subr.bf16.mxu1 %v3276_v55 }
 0x20a   :  { %2161 = vmatpush1.bf16.msra.mxu0 %v3271_v56  ;;  %2202 = vmatpush1.bf16.msra.mxu1 %v3274_v57 }
 0x20b   :  { %2162 = vmatprep.subr.bf16.mxu0 %v3279_v58  ;;  %2203 = vmatprep.subr.bf16.mxu1 %v3282_v59 }
 0x20e   :  { %2163 = vmatpush1.bf16.msra.mxu0 %v3277_v60  ;;  %2204 = vmatpush1.bf16.msra.mxu1 %v3280_v61 }
 0x20f   :  { %2164 = vmatprep.subr.bf16.mxu0 %v3285_v62  ;;  %2205 = vmatprep.subr.bf16.mxu1 %v3288_v63  ;;  %v3331_v62 = vld [vmem:[#allocation5 + $0x4e0] ss:$16 sps:$4 sm:$0xff]  }
 0x210   :  { %v3334_v63 = vld [vmem:[#allocation5 + $0x6e0] ss:$16 sps:$4 sm:$0xff]  }
 0x212   :  { %2165 = vmatpush2.bf16.msra.mxu0 %v3283_v0  ;;  %2206 = vmatpush2.bf16.msra.mxu1 %v3286_v1  ;;  %v303_v0 = vrot.slane %v3898_v37, %v302_v50  ;;  %v311_v1 = vrot.slane %v3898_v37, %v310_v51  ;;  %v3373_v50 = vld [vmem:[#allocation5 + $0x400] ss:$16 sps:$4 sm:$0xff]  }
 0x213   :  { %2166 = vmatprep.subr.bf16.mxu0 %v3291_v2  ;;  %2207 = vmatprep.subr.bf16.mxu1 %v3294_v3  ;;  %v3376_v51 = vld [vmem:[#allocation5 + $0x600] ss:$16 sps:$4 sm:$0xff]  }
 0x216   :  { %2167 = vmatpush2.bf16.msra.mxu0 %v3289_v4  ;;  %2208 = vmatpush2.bf16.msra.mxu1 %v3292_v5 }
 0x217   :  { %2168 = vmatprep.subr.bf16.mxu0 %v3297_v9  ;;  %2209 = vmatprep.subr.bf16.mxu1 %v3300_v10  ;;  %v3339_v9 = vld [vmem:[#allocation5 + $0x4c4] ss:$16 sps:$4 sm:$0xff]  }
 0x218   :  { %v3342_v10 = vld [vmem:[#allocation5 + $0x6c4] ss:$16 sps:$4 sm:$0xff]  }
 0x21a   :  { %2169 = vmatpush2.bf16.msra.mxu0 %v3295_v11  ;;  %2210 = vmatpush2.bf16.msra.mxu1 %v3298_v12 }
 0x21b   :  { %2170 = vmatprep.subr.bf16.mxu0 %v3303_v13  ;;  %2211 = vmatprep.subr.bf16.mxu1 %v3306_v14 }
 0x21e   :  { %2171 = vmatpush2.bf16.msra.mxu0 %v3301_v15  ;;  %2212 = vmatpush2.bf16.msra.mxu1 %v3304_v16  ;;  %v3337_v15 = vld [vmem:[#allocation5 + $0x4c0] ss:$16 sps:$4 sm:$0xff]  }
 0x21f   :  { %2172 = vmatprep.subr.bf16.mxu0 %v3309_v17  ;;  %2213 = vmatprep.subr.bf16.mxu1 %v3312_v18  ;;  %v3340_v16 = vld [vmem:[#allocation5 + $0x6c0] ss:$16 sps:$4 sm:$0xff]  }
 0x222   :  { %2173 = vmatpush2.bf16.msra.mxu0 %v3307_v19  ;;  %2214 = vmatpush2.bf16.msra.mxu1 %v3310_v20  ;;  %v3345_v19 = vld [vmem:[#allocation5 + $0x4a4] ss:$16 sps:$4 sm:$0xff]  }
 0x223   :  { %2174 = vmatprep.subr.bf16.mxu0 %v3315_v21  ;;  %2215 = vmatprep.subr.bf16.mxu1 %v3318_v22  ;;  %v3348_v20 = vld [vmem:[#allocation5 + $0x6a4] ss:$16 sps:$4 sm:$0xff]  }
 0x226   :  { %2175 = vmatpush2.bf16.msra.mxu0 %v3313_v23  ;;  %2216 = vmatpush2.bf16.msra.mxu1 %v3316_v24 }
 0x227   :  { %2176 = vmatprep.subr.bf16.mxu0 %v3321_v25  ;;  %2217 = vmatprep.subr.bf16.mxu1 %v3324_v26 }
 0x22a   :  { %2177 = vmatpush2.bf16.msra.mxu0 %v3319_v27  ;;  %2218 = vmatpush2.bf16.msra.mxu1 %v3322_v28  ;;  %v3343_v27 = vld [vmem:[#allocation5 + $0x4a0] ss:$16 sps:$4 sm:$0xff]  }
 0x22b   :  { %2178 = vmatprep.subr.bf16.mxu0 %v3327_v29  ;;  %2219 = vmatprep.subr.bf16.mxu1 %v3330_v30  ;;  %v3346_v28 = vld [vmem:[#allocation5 + $0x6a0] ss:$16 sps:$4 sm:$0xff]   ;;  %v3351_v29 = vld [vmem:[#allocation5 + $0x484] ss:$16 sps:$4 sm:$0xff]  }
 0x22c   :  { %v3354_v30 = vld [vmem:[#allocation5 + $0x684] ss:$16 sps:$4 sm:$0xff]  }
 0x22e   :  { %2179 = vmatpush2.bf16.msra.mxu0 %v3325_v31  ;;  %2220 = vmatpush2.bf16.msra.mxu1 %v3328_v32  ;;  %v3349_v31 = vld [vmem:[#allocation5 + $0x480] ss:$16 sps:$4 sm:$0xff]  }
 0x22f   :  { %2230 = vmatprep.subr.bf16.mxu0 %v3333_v34  ;;  %2271 = vmatprep.subr.bf16.mxu1 %v3336_v35  ;;  %v3352_v32 = vld [vmem:[#allocation5 + $0x680] ss:$16 sps:$4 sm:$0xff]   ;;  %v3357_v34 = vld [vmem:[#allocation5 + $0x464] ss:$16 sps:$4 sm:$0xff]  }
 0x230   :  { %v3360_v35 = vld [vmem:[#allocation5 + $0x664] ss:$16 sps:$4 sm:$0xff]  }
 0x2a9   :  { %v444_v42 = vpop.f32.mrf.mxu0  ;;  %v485_v43 = vpop.f32.mrf.mxu1 }
 0x2aa   :  { %v445_v44 = vadd.f32 %v444_v42, %v283_v39  ;;  %v486_v45 = vadd.f32 %v485_v43, %v291_v33  ;;  %v3355_v39 = vld [vmem:[#allocation5 + $0x460] ss:$16 sps:$4 sm:$0xff]  }
 0x2ab   :  { %v446_v46 = vpop.f32.mrf.mxu0  ;;  %v487_v47 = vpop.f32.mrf.mxu1  ;;  %v3358_v33 = vld [vmem:[#allocation5 + $0x660] ss:$16 sps:$4 sm:$0xff]  }
 0x2ac   :  { %v447_v48 = vadd.f32 %v446_v46, %v287_v40  ;;  %v488_v49 = vadd.f32 %v487_v47, %v295_v41  ;;  %v574_v52 = vmax.f32 %v445_v44, 0.0  ;;  %v576_v53 = vmax.f32 %v486_v45, 0.0  ;;  %v3363_v40 = vld [vmem:[#allocation5 + $0x444] ss:$16 sps:$4 sm:$0xff]   ;;  %v3361_v42 = vld [vmem:[#allocation5 + $0x440] ss:$16 sps:$4 sm:$0xff]  }
 0x2ad   :  { %v448_v54 = vpop.f32.mrf.mxu0  ;;  %v489_v55 = vpop.f32.mrf.mxu1  ;;  %v3366_v41 = vld [vmem:[#allocation5 + $0x644] ss:$16 sps:$4 sm:$0xff]   ;;  %v3364_v43 = vld [vmem:[#allocation5 + $0x640] ss:$16 sps:$4 sm:$0xff]  }
 0x2ae   :  { %v575_v56 = vmax.f32 %v447_v48, 0.0  ;;  %v577_v57 = vmax.f32 %v488_v49, 0.0  ;;  %v3919_v2 = vpack.c.bf16 %v574_v52, %v574_v52  ;;  %v3921_v3 = vpack.c.bf16 %v576_v53, %v576_v53  ;;  %v3369_v44 = vld [vmem:[#allocation5 + $0x424] ss:$16 sps:$4 sm:$0xff]   ;;  %v3367_v46 = vld [vmem:[#allocation5 + $0x420] ss:$16 sps:$4 sm:$0xff]  }
 0x2af   :  { %v449_v58 = vpop.f32.mrf.mxu0  ;;  %v490_v59 = vpop.f32.mrf.mxu1  ;;  %v3372_v45 = vld [vmem:[#allocation5 + $0x624] ss:$16 sps:$4 sm:$0xff]   ;;  %v3370_v47 = vld [vmem:[#allocation5 + $0x620] ss:$16 sps:$4 sm:$0xff]  }
 0x2b0   :  { %v3913_v60 = vpack.c.bf16 %v575_v56, %v575_v56  ;;  %v3915_v61 = vpack.c.bf16 %v577_v57, %v577_v57  ;;  %v3375_v48 = vld [vmem:[#allocation5 + $0x404] ss:$16 sps:$4 sm:$0xff]   ;;  %v3379_v54 = vld [vmem:[#allocation5 + $0x5e0] ss:$16 sps:$4 sm:$0xff]  }
 0x2b1   :  { %v3923_v4 = vpop.f32.mrf.mxu0  ;;  %v3925_v5 = vpop.f32.mrf.mxu1  ;;  %v3378_v49 = vld [vmem:[#allocation5 + $0x604] ss:$16 sps:$4 sm:$0xff]   ;;  %v3382_v55 = vld [vmem:[#allocation5 + $0x7e0] ss:$16 sps:$4 sm:$0xff]  }
 0x2b2   :  { %2180 = vmatprep.mubr.bf16.mxu0 %v3913_v60  ;;  %2221 = vmatprep.mubr.bf16.mxu1 %v3915_v61  ;;  %v3381_v52 = vld [vmem:[#allocation5 + $0x5e4] ss:$16 sps:$4 sm:$0xff]   ;;  %v3385_v58 = vld [vmem:[#allocation5 + $0x5c0] ss:$16 sps:$4 sm:$0xff]  }
 0x2b3   :  { %v528_v11 = vpop.f32.mrf.mxu0  ;;  %v569_v12 = vpop.f32.mrf.mxu1  ;;  %2181 = vmatmul.mubr.bf16.vlgmr.msra.gmra.mxu0 %v3919_v2  ;;  %2222 = vmatmul.mubr.bf16.vlgmr.msra.gmra.mxu1 %v3921_v3  ;;  %v3384_v53 = vld [vmem:[#allocation5 + $0x7e4] ss:$16 sps:$4 sm:$0xff]   ;;  %v3388_v59 = vld [vmem:[#allocation5 + $0x7c0] ss:$16 sps:$4 sm:$0xff]  }
 0x2b4   :  { %v529_v13 = vadd.f32 %v528_v11, %v303_v0  ;;  %v570_v14 = vadd.f32 %v569_v12, %v311_v1  ;;  %2231 = vmatpush1.bf16.msra.mxu0 %v3331_v62  ;;  %2272 = vmatpush1.bf16.msra.mxu1 %v3334_v63  ;;  %v3387_v56 = vld [vmem:[#allocation5 + $0x5c4] ss:$16 sps:$4 sm:$0xff]   ;;  %v3391_v0 = vld [vmem:[#allocation5 + $0x5a0] ss:$16 sps:$4 sm:$0xff]  }
 0x2b5   :  { %v530_v17 = vpop.f32.mrf.mxu0  ;;  %v571_v18 = vpop.f32.mrf.mxu1  ;;  %2232 = vmatprep.subr.bf16.mxu0 %v3339_v9  ;;  %2273 = vmatprep.subr.bf16.mxu1 %v3342_v10  ;;  %v3390_v57 = vld [vmem:[#allocation5 + $0x7c4] ss:$16 sps:$4 sm:$0xff]   ;;  %v3394_v1 = vld [vmem:[#allocation5 + $0x7a0] ss:$16 sps:$4 sm:$0xff]  }
 0x2b6   :  { %v579_v21 = vmax.f32 %v529_v13, 0.0  ;;  %v581_v22 = vmax.f32 %v570_v14, 0.0  ;;  %v3393_v62 = vld [vmem:[#allocation5 + $0x5a4] ss:$16 sps:$4 sm:$0xff]   ;;  %v3397_v11 = vld [vmem:[#allocation5 + $0x580] ss:$16 sps:$4 sm:$0xff]  }
 0x2b7   :  { %v531_v23 = vpop.f32.mrf.mxu0  ;;  %v572_v24 = vpop.f32.mrf.mxu1  ;;  %v3396_v63 = vld [vmem:[#allocation5 + $0x7a4] ss:$16 sps:$4 sm:$0xff]   ;;  %v3400_v12 = vld [vmem:[#allocation5 + $0x780] ss:$16 sps:$4 sm:$0xff]   ;;  %v298_v17 = vsub.s32 4, %v3854_v6  ;;  %v306_v18 = vsub.s32 6, %v3854_v6 }
 0x2b8   :  { %v3931_v25 = vpack.c.bf16 %v579_v21, %v579_v21  ;;  %v3933_v26 = vpack.c.bf16 %v581_v22, %v581_v22  ;;  %2233 = vmatpush1.bf16.msra.mxu0 %v3337_v15  ;;  %2274 = vmatpush1.bf16.msra.mxu1 %v3340_v16  ;;  %v3399_v9 = vld [vmem:[#allocation5 + $0x584] ss:$16 sps:$4 sm:$0xff]   ;;  %v3403_v15 = vld [vmem:[#allocation5 + $0x560] ss:$16 sps:$4 sm:$0xff]  }
 0x2b9   :  { %2234 = vmatprep.subr.bf16.mxu0 %v3345_v19  ;;  %2275 = vmatprep.subr.bf16.mxu1 %v3348_v20  ;;  %v3402_v10 = vld [vmem:[#allocation5 + $0x784] ss:$16 sps:$4 sm:$0xff]   ;;  %v3406_v16 = vld [vmem:[#allocation5 + $0x760] ss:$16 sps:$4 sm:$0xff]   ;;  %v299_v23 = vrot.slane %v3898_v37, %v298_v17  ;;  %v307_v24 = vrot.slane %v3898_v37, %v306_v18  ;;  %v3480_v17 = vld [vmem:[#allocation5 + $0x3ec] ss:$16 sps:$4 sm:$0xff]  }
 0x2ba   :  { %2262 = vmatprep.mubr.bf16.mxu0 %v3931_v25  ;;  %2303 = vmatprep.mubr.bf16.mxu1 %v3933_v26  ;;  %v3405_v13 = vld [vmem:[#allocation5 + $0x564] ss:$16 sps:$4 sm:$0xff]   ;;  %v3409_v21 = vld [vmem:[#allocation5 + $0x540] ss:$16 sps:$4 sm:$0xff]   ;;  %v3475_v18 = vld [vmem:[#allocation5 + $0x1e8] ss:$16 sps:$4 sm:$0xff]  }
 0x2bb   :  { %v3408_v14 = vld [vmem:[#allocation5 + $0x764] ss:$16 sps:$4 sm:$0xff]   ;;  %v3412_v22 = vld [vmem:[#allocation5 + $0x740] ss:$16 sps:$4 sm:$0xff]  }
 0x2bc   :  { %2235 = vmatpush1.bf16.msra.mxu0 %v3343_v27  ;;  %2276 = vmatpush1.bf16.msra.mxu1 %v3346_v28  ;;  %v3411_v19 = vld [vmem:[#allocation5 + $0x544] ss:$16 sps:$4 sm:$0xff]   ;;  %v3424_v37 = vld [vmem:[#allocation5 + $0x700] ss:$16 sps:$4 sm:$0xff]  }
 0x2bd   :  { %2236 = vmatprep.subr.bf16.mxu0 %v3351_v29  ;;  %2277 = vmatprep.subr.bf16.mxu1 %v3354_v30  ;;  %v3414_v20 = vld [vmem:[#allocation5 + $0x744] ss:$16 sps:$4 sm:$0xff]   ;;  %v3415_v29 = vld [vmem:[#allocation5 + $0x520] ss:$16 sps:$4 sm:$0xff]  }
 0x2be   :  { %v3417_v27 = vld [vmem:[#allocation5 + $0x524] ss:$16 sps:$4 sm:$0xff]   ;;  %v3418_v30 = vld [vmem:[#allocation5 + $0x720] ss:$16 sps:$4 sm:$0xff]  }
 0x2bf   :  { %v3420_v28 = vld [vmem:[#allocation5 + $0x724] ss:$16 sps:$4 sm:$0xff]  }
 0x2c0   :  { %2237 = vmatpush1.bf16.msra.mxu0 %v3349_v31  ;;  %2278 = vmatpush1.bf16.msra.mxu1 %v3352_v32  ;;  %v527_v31 = vadd.f32 %v3923_v4, %v299_v23  ;;  %v568_v32 = vadd.f32 %v3925_v5, %v307_v24  ;;  %v3484_v23 = vld [vmem:[#allocation5 + $0x3c8] ss:$16 sps:$4 sm:$0xff]   ;;  %v3489_v24 = vld [vmem:[#allocation5 + $0x1ac] ss:$16 sps:$4 sm:$0xff]  }
 0x2c1   :  { %2238 = vmatprep.subr.bf16.mxu0 %v3357_v34  ;;  %2279 = vmatprep.subr.bf16.mxu1 %v3360_v35  ;;  %v3423_v34 = vld [vmem:[#allocation5 + $0x504] ss:$16 sps:$4 sm:$0xff]  }
 0x2c2   :  { %v3426_v35 = vld [vmem:[#allocation5 + $0x704] ss:$16 sps:$4 sm:$0xff]  }
 0x2c4   :  { %2239 = vmatpush1.bf16.msra.mxu0 %v3355_v39  ;;  %2280 = vmatpush1.bf16.msra.mxu1 %v3358_v33  ;;  %v3421_v39 = vld [vmem:[#allocation5 + $0x500] ss:$16 sps:$4 sm:$0xff]   ;;  %v578_v33 = vmax.f32 %v527_v31, 0.0  ;;  %v3498_v31 = vld [vmem:[#allocation5 + $0x38c] ss:$16 sps:$4 sm:$0xff]  }
 0x2c5   :  { %2240 = vmatprep.subr.bf16.mxu0 %v3363_v40  ;;  %2281 = vmatprep.subr.bf16.mxu1 %v3366_v41  ;;  %v580_v40 = vmax.f32 %v568_v32, 0.0  ;;  %v3429_v41 = vld [vmem:[#allocation5 + $0xec] ss:$16 sps:$4 sm:$0xff]   ;;  %v3493_v32 = vld [vmem:[#allocation5 + $0x188] ss:$16 sps:$4 sm:$0xff]  }
 0x2c6   :  { %v3943_v4 = vpack.c.bf16 %v578_v33, %v578_v33  ;;  %v3502_v33 = vld [vmem:[#allocation5 + $0x368] ss:$16 sps:$4 sm:$0xff]  }
 0x2c7   :  { %v3945_v5 = vpack.c.bf16 %v580_v40, %v580_v40  ;;  %v3507_v40 = vld [vmem:[#allocation5 + $0x14c] ss:$16 sps:$4 sm:$0xff]  }
 0x2c8   :  { %2241 = vmatpush1.bf16.msra.mxu0 %v3361_v42  ;;  %2282 = vmatpush1.bf16.msra.mxu1 %v3364_v43  ;;  %v3432_v42 = vld [vmem:[#allocation5 + $0x2ec] ss:$16 sps:$4 sm:$0xff]   ;;  %v3427_v43 = vld [vmem:[#allocation5 + $0xe8] ss:$16 sps:$4 sm:$0xff]  }
 0x2c9   :  { %2242 = vmatprep.subr.bf16.mxu0 %v3369_v44  ;;  %2283 = vmatprep.subr.bf16.mxu1 %v3372_v45  ;;  %v3430_v44 = vld [vmem:[#allocation5 + $0x2e8] ss:$16 sps:$4 sm:$0xff]   ;;  %v3435_v45 = vld [vmem:[#allocation5 + $0xcc] ss:$16 sps:$4 sm:$0xff]  }
 0x2cc   :  { %2243 = vmatpush1.bf16.msra.mxu0 %v3367_v46  ;;  %2284 = vmatpush1.bf16.msra.mxu1 %v3370_v47  ;;  %v3438_v46 = vld [vmem:[#allocation5 + $0x2cc] ss:$16 sps:$4 sm:$0xff]   ;;  %v3433_v47 = vld [vmem:[#allocation5 + $0xc8] ss:$16 sps:$4 sm:$0xff]  }
 0x2cd   :  { %2244 = vmatprep.subr.bf16.mxu0 %v3375_v48  ;;  %2285 = vmatprep.subr.bf16.mxu1 %v3378_v49  ;;  %v3436_v48 = vld [vmem:[#allocation5 + $0x2c8] ss:$16 sps:$4 sm:$0xff]   ;;  %v3441_v49 = vld [vmem:[#allocation5 + $0xac] ss:$16 sps:$4 sm:$0xff]  }
 0x2d0   :  { %2245 = vmatpush1.bf16.msra.mxu0 %v3373_v50  ;;  %2286 = vmatpush1.bf16.msra.mxu1 %v3376_v51  ;;  %v3444_v50 = vld [vmem:[#allocation5 + $0x2ac] ss:$16 sps:$4 sm:$0xff]   ;;  %v3439_v51 = vld [vmem:[#allocation5 + $0xa8] ss:$16 sps:$4 sm:$0xff]  }
 0x2d1   :  { %2246 = vmatprep.subr.bf16.mxu0 %v3381_v52  ;;  %2287 = vmatprep.subr.bf16.mxu1 %v3384_v53  ;;  %v3442_v52 = vld [vmem:[#allocation5 + $0x2a8] ss:$16 sps:$4 sm:$0xff]   ;;  %v3447_v53 = vld [vmem:[#allocation5 + $0x8c] ss:$16 sps:$4 sm:$0xff]  }
 0x2d4   :  { %2247 = vmatpush2.bf16.msra.mxu0 %v3379_v54  ;;  %2288 = vmatpush2.bf16.msra.mxu1 %v3382_v55  ;;  %v3450_v54 = vld [vmem:[#allocation5 + $0x28c] ss:$16 sps:$4 sm:$0xff]   ;;  %v3445_v55 = vld [vmem:[#allocation5 + $0x88] ss:$16 sps:$4 sm:$0xff]  }
 0x2d5   :  { %2248 = vmatprep.subr.bf16.mxu0 %v3387_v56  ;;  %2289 = vmatprep.subr.bf16.mxu1 %v3390_v57  ;;  %v3453_v56 = vld [vmem:[#allocation5 + $0x6c] ss:$16 sps:$4 sm:$0xff]   ;;  %v3451_v57 = vld [vmem:[#allocation5 + $0x68] ss:$16 sps:$4 sm:$0xff]  }
 0x2d8   :  { %2249 = vmatpush2.bf16.msra.mxu0 %v3385_v58  ;;  %2290 = vmatpush2.bf16.msra.mxu1 %v3388_v59  ;;  %v3454_v58 = vld [vmem:[#allocation5 + $0x268] ss:$16 sps:$4 sm:$0xff]   ;;  %v3459_v59 = vld [vmem:[#allocation5 + $0x4c] ss:$16 sps:$4 sm:$0xff]  }
 0x2d9   :  { %2250 = vmatprep.subr.bf16.mxu0 %v3393_v62  ;;  %2291 = vmatprep.subr.bf16.mxu1 %v3396_v63  ;;  %v3462_v62 = vld [vmem:[#allocation5 + $0x24c] ss:$16 sps:$4 sm:$0xff]   ;;  %v3457_v63 = vld [vmem:[#allocation5 + $0x48] ss:$16 sps:$4 sm:$0xff]  }
 0x2dc   :  { %2251 = vmatpush2.bf16.msra.mxu0 %v3391_v0  ;;  %2292 = vmatpush2.bf16.msra.mxu1 %v3394_v1  ;;  %v3460_v0 = vld [vmem:[#allocation5 + $0x248] ss:$16 sps:$4 sm:$0xff]   ;;  %v3465_v1 = vld [vmem:[#allocation5 + $0x2c] ss:$16 sps:$4 sm:$0xff]  }
 0x2dd   :  { %2252 = vmatprep.subr.bf16.mxu0 %v3399_v9  ;;  %2293 = vmatprep.subr.bf16.mxu1 %v3402_v10  ;;  %v3468_v9 = vld [vmem:[#allocation5 + $0x22c] ss:$16 sps:$4 sm:$0xff]   ;;  %v3463_v10 = vld [vmem:[#allocation5 + $0x28] ss:$16 sps:$4 sm:$0xff]  }
 0x2e0   :  { %2253 = vmatpush2.bf16.msra.mxu0 %v3397_v11  ;;  %2294 = vmatpush2.bf16.msra.mxu1 %v3400_v12  ;;  %v3466_v11 = vld [vmem:[#allocation5 + $0x228] ss:$16 sps:$4 sm:$0xff]   ;;  %v3471_v12 = vld [vmem:[#allocation5 + $0xc] ss:$16 sps:$4 sm:$0xff]  }
 0x2e1   :  { %2254 = vmatprep.subr.bf16.mxu0 %v3405_v13  ;;  %2295 = vmatprep.subr.bf16.mxu1 %v3408_v14  ;;  %v3474_v13 = vld [vmem:[#allocation5 + $0x20c] ss:$16 sps:$4 sm:$0xff]   ;;  %v3469_v14 = vld [vmem:[#allocation5 + $0x8] ss:$16 sps:$4 sm:$0xff]  }
 0x2e4   :  { %2255 = vmatpush2.bf16.msra.mxu0 %v3403_v15  ;;  %2296 = vmatpush2.bf16.msra.mxu1 %v3406_v16  ;;  %v3472_v15 = vld [vmem:[#allocation5 + $0x208] ss:$16 sps:$4 sm:$0xff]   ;;  %v3477_v16 = vld [vmem:[#allocation5 + $0x1ec] ss:$16 sps:$4 sm:$0xff]  }
 0x2e5   :  { %2256 = vmatprep.subr.bf16.mxu0 %v3411_v19  ;;  %2297 = vmatprep.subr.bf16.mxu1 %v3414_v20  ;;  %v3478_v19 = vld [vmem:[#allocation5 + $0x3e8] ss:$16 sps:$4 sm:$0xff]   ;;  %v3483_v20 = vld [vmem:[#allocation5 + $0x1cc] ss:$16 sps:$4 sm:$0xff]  }
 0x2e8   :  { %2257 = vmatpush2.bf16.msra.mxu0 %v3409_v21  ;;  %2298 = vmatpush2.bf16.msra.mxu1 %v3412_v22  ;;  %v3486_v21 = vld [vmem:[#allocation5 + $0x3cc] ss:$16 sps:$4 sm:$0xff]   ;;  %v3481_v22 = vld [vmem:[#allocation5 + $0x1c8] ss:$16 sps:$4 sm:$0xff]  }
 0x2e9   :  { %2258 = vmatprep.subr.bf16.mxu0 %v3417_v27  ;;  %2299 = vmatprep.subr.bf16.mxu1 %v3420_v28  ;;  %v3492_v27 = vld [vmem:[#allocation5 + $0x3ac] ss:$16 sps:$4 sm:$0xff]   ;;  %v3487_v28 = vld [vmem:[#allocation5 + $0x1a8] ss:$16 sps:$4 sm:$0xff]  }
 0x2ec   :  { %2259 = vmatpush2.bf16.msra.mxu0 %v3415_v29  ;;  %2300 = vmatpush2.bf16.msra.mxu1 %v3418_v30  ;;  %v3490_v29 = vld [vmem:[#allocation5 + $0x3a8] ss:$16 sps:$4 sm:$0xff]   ;;  %v3495_v30 = vld [vmem:[#allocation5 + $0x18c] ss:$16 sps:$4 sm:$0xff]  }
 0x2ed   :  { %2260 = vmatprep.subr.bf16.mxu0 %v3423_v34  ;;  %2301 = vmatprep.subr.bf16.mxu1 %v3426_v35  ;;  %v3496_v34 = vld [vmem:[#allocation5 + $0x388] ss:$16 sps:$4 sm:$0xff]   ;;  %v3501_v35 = vld [vmem:[#allocation5 + $0x16c] ss:$16 sps:$4 sm:$0xff]  }
 0x2f0   :  { %2261 = vmatpush2.bf16.msra.mxu0 %v3421_v39  ;;  %2302 = vmatpush2.bf16.msra.mxu1 %v3424_v37  ;;  %v3504_v39 = vld [vmem:[#allocation5 + $0x36c] ss:$16 sps:$4 sm:$0xff]   ;;  %v3499_v37 = vld [vmem:[#allocation5 + $0x168] ss:$16 sps:$4 sm:$0xff]  }
 0x2f1   :  { %2312 = vmatprep.subr.bf16.mxu0 %v3429_v41  ;;  %2353 = vmatprep.subr.bf16.mxu1 %v3432_v42  ;;  %v3510_v41 = vld [vmem:[#allocation5 + $0x34c] ss:$16 sps:$4 sm:$0xff]   ;;  %v3505_v42 = vld [vmem:[#allocation5 + $0x148] ss:$16 sps:$4 sm:$0xff]  }
 0x2f3   :  { %2263 = vmatmul.mubr.bf16.vlgmr.msra.gmra.mxu0 %v3943_v4  ;;  %2304 = vmatmul.mubr.bf16.vlgmr.msra.gmra.mxu1 %v3945_v5 }
 0x2f4   :  { %2313 = vmatpush1.bf16.msra.mxu0 %v3427_v43  ;;  %2344 = vmatprep.mubr.bf16.mxu0 %v3913_v60  ;;  %v3448_v60 = vld [vmem:[#allocation5 + $0x288] ss:$16 sps:$4 sm:$0xff]  }
 0x2f5   :  { %2354 = vmatpush1.bf16.msra.mxu1 %v3430_v44  ;;  %2385 = vmatprep.mubr.bf16.mxu1 %v3915_v61  ;;  %v3456_v61 = vld [vmem:[#allocation5 + $0x26c] ss:$16 sps:$4 sm:$0xff]   ;;  %v3508_v43 = vld [vmem:[#allocation5 + $0x348] ss:$16 sps:$4 sm:$0xff]  }
 0x2f6   :  { %2314 = vmatprep.subr.bf16.mxu0 %v3435_v45  ;;  %2355 = vmatprep.subr.bf16.mxu1 %v3438_v46  ;;  %v3513_v44 = vld [vmem:[#allocation5 + $0x12c] ss:$16 sps:$4 sm:$0xff]   ;;  %v3511_v46 = vld [vmem:[#allocation5 + $0x128] ss:$16 sps:$4 sm:$0xff]  }
 0x2f7   :  { %v3516_v45 = vld [vmem:[#allocation5 + $0x32c] ss:$16 sps:$4 sm:$0xff]  }
 0x2f8   :  { %2315 = vmatpush1.bf16.msra.mxu0 %v3433_v47  ;;  %v3514_v47 = vld [vmem:[#allocation5 + $0x328] ss:$16 sps:$4 sm:$0xff]  }
 0x2f9   :  { %2356 = vmatpush1.bf16.msra.mxu1 %v3436_v48  ;;  %2316 = vmatprep.subr.bf16.mxu0 %v3441_v49  ;;  %v3519_v48 = vld [vmem:[#allocation5 + $0x10c] ss:$16 sps:$4 sm:$0xff]  }
 0x2fa   :  { %2357 = vmatprep.subr.bf16.mxu1 %v3444_v50  ;;  %v3522_v49 = vld [vmem:[#allocation5 + $0x30c] ss:$16 sps:$4 sm:$0xff]   ;;  %v3517_v50 = vld [vmem:[#allocation5 + $0x108] ss:$16 sps:$4 sm:$0xff]  }
 0x2fc   :  { %2317 = vmatpush1.bf16.msra.mxu0 %v3439_v51  ;;  %v3520_v51 = vld [vmem:[#allocation5 + $0x308] ss:$16 sps:$4 sm:$0xff]  }
 0x2fd   :  { %2358 = vmatpush1.bf16.msra.mxu1 %v3442_v52  ;;  %2318 = vmatprep.subr.bf16.mxu0 %v3447_v53  ;;  %v3525_v52 = vld [vmem:[#allocation5 + $0x4ec] ss:$16 sps:$4 sm:$0xff]  }
 0x2fe   :  { %2359 = vmatprep.subr.bf16.mxu1 %v3450_v54  ;;  %v3528_v53 = vld [vmem:[#allocation5 + $0x6ec] ss:$16 sps:$4 sm:$0xff]   ;;  %v3523_v54 = vld [vmem:[#allocation5 + $0x4e8] ss:$16 sps:$4 sm:$0xff]  }
 0x300   :  { %2319 = vmatpush1.bf16.msra.mxu0 %v3445_v55  ;;  %v3526_v55 = vld [vmem:[#allocation5 + $0x6e8] ss:$16 sps:$4 sm:$0xff]  }
 0x301   :  { %2360 = vmatpush1.bf16.msra.mxu1 %v3448_v60  ;;  %2320 = vmatprep.subr.bf16.mxu0 %v3453_v56  ;;  %v3531_v60 = vld [vmem:[#allocation5 + $0x4cc] ss:$16 sps:$4 sm:$0xff]  }
 0x302   :  { %2361 = vmatprep.subr.bf16.mxu1 %v3456_v61  ;;  %v3534_v56 = vld [vmem:[#allocation5 + $0x6cc] ss:$16 sps:$4 sm:$0xff]   ;;  %v3529_v61 = vld [vmem:[#allocation5 + $0x4c8] ss:$16 sps:$4 sm:$0xff]  }
 0x304   :  { %2321 = vmatpush1.bf16.msra.mxu0 %v3451_v57  ;;  %v3532_v57 = vld [vmem:[#allocation5 + $0x6c8] ss:$16 sps:$4 sm:$0xff]  }
 0x305   :  { %2362 = vmatpush1.bf16.msra.mxu1 %v3454_v58  ;;  %2322 = vmatprep.subr.bf16.mxu0 %v3459_v59  ;;  %v3537_v58 = vld [vmem:[#allocation5 + $0x4ac] ss:$16 sps:$4 sm:$0xff]  }
 0x306   :  { %2363 = vmatprep.subr.bf16.mxu1 %v3462_v62  ;;  %v3540_v59 = vld [vmem:[#allocation5 + $0x6ac] ss:$16 sps:$4 sm:$0xff]   ;;  %v3535_v62 = vld [vmem:[#allocation5 + $0x4a8] ss:$16 sps:$4 sm:$0xff]  }
 0x308   :  { %2323 = vmatpush1.bf16.msra.mxu0 %v3457_v63  ;;  %v3543_v63 = vld [vmem:[#allocation5 + $0x48c] ss:$16 sps:$4 sm:$0xff]  }
 0x309   :  { %2364 = vmatpush1.bf16.msra.mxu1 %v3460_v0  ;;  %2324 = vmatprep.subr.bf16.mxu0 %v3465_v1  ;;  %v3541_v0 = vld [vmem:[#allocation5 + $0x488] ss:$16 sps:$4 sm:$0xff]   ;;  %v3549_v1 = vld [vmem:[#allocation5 + $0x46c] ss:$16 sps:$4 sm:$0xff]  }
 0x30a   :  { %2365 = vmatprep.subr.bf16.mxu1 %v3468_v9  ;;  %v3552_v9 = vld [vmem:[#allocation5 + $0x66c] ss:$16 sps:$4 sm:$0xff]  }
 0x30c   :  { %2325 = vmatpush1.bf16.msra.mxu0 %v3463_v10  ;;  %v3550_v10 = vld [vmem:[#allocation5 + $0x668] ss:$16 sps:$4 sm:$0xff]  }
 0x30d   :  { %2366 = vmatpush1.bf16.msra.mxu1 %v3466_v11  ;;  %2326 = vmatprep.subr.bf16.mxu0 %v3471_v12  ;;  %v3555_v11 = vld [vmem:[#allocation5 + $0x44c] ss:$16 sps:$4 sm:$0xff]  }
 0x30e   :  { %2367 = vmatprep.subr.bf16.mxu1 %v3474_v13  ;;  %v3558_v12 = vld [vmem:[#allocation5 + $0x64c] ss:$16 sps:$4 sm:$0xff]   ;;  %v3553_v13 = vld [vmem:[#allocation5 + $0x448] ss:$16 sps:$4 sm:$0xff]  }
 0x310   :  { %2327 = vmatpush1.bf16.msra.mxu0 %v3469_v14  ;;  %v3556_v14 = vld [vmem:[#allocation5 + $0x648] ss:$16 sps:$4 sm:$0xff]  }
 0x311   :  { %2368 = vmatpush1.bf16.msra.mxu1 %v3472_v15  ;;  %2328 = vmatprep.subr.bf16.mxu0 %v3477_v16  ;;  %v3561_v15 = vld [vmem:[#allocation5 + $0x42c] ss:$16 sps:$4 sm:$0xff]  }
 0x312   :  { %2369 = vmatprep.subr.bf16.mxu1 %v3480_v17  ;;  %v3564_v16 = vld [vmem:[#allocation5 + $0x62c] ss:$16 sps:$4 sm:$0xff]   ;;  %v3559_v17 = vld [vmem:[#allocation5 + $0x428] ss:$16 sps:$4 sm:$0xff]  }
 0x314   :  { %2329 = vmatpush2.bf16.msra.mxu0 %v3475_v18  ;;  %v3562_v18 = vld [vmem:[#allocation5 + $0x628] ss:$16 sps:$4 sm:$0xff]  }
 0x315   :  { %2370 = vmatpush2.bf16.msra.mxu1 %v3478_v19  ;;  %2330 = vmatprep.subr.bf16.mxu0 %v3483_v20  ;;  %v3567_v19 = vld [vmem:[#allocation5 + $0x40c] ss:$16 sps:$4 sm:$0xff]  }
 0x316   :  { %2371 = vmatprep.subr.bf16.mxu1 %v3486_v21  ;;  %v3570_v20 = vld [vmem:[#allocation5 + $0x60c] ss:$16 sps:$4 sm:$0xff]   ;;  %v3565_v21 = vld [vmem:[#allocation5 + $0x408] ss:$16 sps:$4 sm:$0xff]  }
 0x318   :  { %2331 = vmatpush2.bf16.msra.mxu0 %v3481_v22  ;;  %v3568_v22 = vld [vmem:[#allocation5 + $0x608] ss:$16 sps:$4 sm:$0xff]  }
 0x319   :  { %2372 = vmatpush2.bf16.msra.mxu1 %v3484_v23  ;;  %2332 = vmatprep.subr.bf16.mxu0 %v3489_v24  ;;  %v3573_v23 = vld [vmem:[#allocation5 + $0x5ec] ss:$16 sps:$4 sm:$0xff]  }
 0x31a   :  { %2373 = vmatprep.subr.bf16.mxu1 %v3492_v27  ;;  %v3576_v24 = vld [vmem:[#allocation5 + $0x7ec] ss:$16 sps:$4 sm:$0xff]   ;;  %v3571_v27 = vld [vmem:[#allocation5 + $0x5e8] ss:$16 sps:$4 sm:$0xff]  }
 0x31c   :  { %2333 = vmatpush2.bf16.msra.mxu0 %v3487_v28  ;;  %v3574_v28 = vld [vmem:[#allocation5 + $0x7e8] ss:$16 sps:$4 sm:$0xff]  }
 0x31d   :  { %2374 = vmatpush2.bf16.msra.mxu1 %v3490_v29  ;;  %2334 = vmatprep.subr.bf16.mxu0 %v3495_v30  ;;  %v3579_v29 = vld [vmem:[#allocation5 + $0x5cc] ss:$16 sps:$4 sm:$0xff]  }
 0x31e   :  { %2375 = vmatprep.subr.bf16.mxu1 %v3498_v31  ;;  %v3582_v30 = vld [vmem:[#allocation5 + $0x7cc] ss:$16 sps:$4 sm:$0xff]   ;;  %v3577_v31 = vld [vmem:[#allocation5 + $0x5c8] ss:$16 sps:$4 sm:$0xff]  }
 0x320   :  { %2335 = vmatpush2.bf16.msra.mxu0 %v3493_v32  ;;  %v3580_v32 = vld [vmem:[#allocation5 + $0x7c8] ss:$16 sps:$4 sm:$0xff]  }
 0x321   :  { %2376 = vmatpush2.bf16.msra.mxu1 %v3496_v34  ;;  %2336 = vmatprep.subr.bf16.mxu0 %v3501_v35  ;;  %v3585_v34 = vld [vmem:[#allocation5 + $0x5ac] ss:$16 sps:$4 sm:$0xff]  }
 0x322   :  { %2377 = vmatprep.subr.bf16.mxu1 %v3504_v39  ;;  %v3588_v35 = vld [vmem:[#allocation5 + $0x7ac] ss:$16 sps:$4 sm:$0xff]   ;;  %v3583_v39 = vld [vmem:[#allocation5 + $0x5a8] ss:$16 sps:$4 sm:$0xff]  }
 0x324   :  { %2337 = vmatpush2.bf16.msra.mxu0 %v3499_v37  ;;  %v3586_v37 = vld [vmem:[#allocation5 + $0x7a8] ss:$16 sps:$4 sm:$0xff]  }
 0x325   :  { %2378 = vmatpush2.bf16.msra.mxu1 %v3502_v33  ;;  %2338 = vmatprep.subr.bf16.mxu0 %v3507_v40  ;;  %v3591_v33 = vld [vmem:[#allocation5 + $0x58c] ss:$16 sps:$4 sm:$0xff]  }
 0x326   :  { %2379 = vmatprep.subr.bf16.mxu1 %v3510_v41  ;;  %v3594_v40 = vld [vmem:[#allocation5 + $0x78c] ss:$16 sps:$4 sm:$0xff]   ;;  %v3589_v41 = vld [vmem:[#allocation5 + $0x588] ss:$16 sps:$4 sm:$0xff]  }
 0x328   :  { %2339 = vmatpush2.bf16.msra.mxu0 %v3505_v42  ;;  %v3592_v42 = vld [vmem:[#allocation5 + $0x788] ss:$16 sps:$4 sm:$0xff]  }
 0x329   :  { %2380 = vmatpush2.bf16.msra.mxu1 %v3508_v43  ;;  %2340 = vmatprep.subr.bf16.mxu0 %v3513_v44  ;;  %v3597_v43 = vld [vmem:[#allocation5 + $0x56c] ss:$16 sps:$4 sm:$0xff]  }
 0x32a   :  { %2381 = vmatprep.subr.bf16.mxu1 %v3516_v45  ;;  %v3600_v44 = vld [vmem:[#allocation5 + $0x76c] ss:$16 sps:$4 sm:$0xff]   ;;  %v3595_v45 = vld [vmem:[#allocation5 + $0x568] ss:$16 sps:$4 sm:$0xff]  }
 0x32c   :  { %2341 = vmatpush2.bf16.msra.mxu0 %v3511_v46  ;;  %v3598_v46 = vld [vmem:[#allocation5 + $0x768] ss:$16 sps:$4 sm:$0xff]  }
 0x32d   :  { %2382 = vmatpush2.bf16.msra.mxu1 %v3514_v47  ;;  %2342 = vmatprep.subr.bf16.mxu0 %v3519_v48  ;;  %v3603_v47 = vld [vmem:[#allocation5 + $0x54c] ss:$16 sps:$4 sm:$0xff]  }
 0x32e   :  { %2383 = vmatprep.subr.bf16.mxu1 %v3522_v49  ;;  %v3606_v48 = vld [vmem:[#allocation5 + $0x74c] ss:$16 sps:$4 sm:$0xff]   ;;  %v3601_v49 = vld [vmem:[#allocation5 + $0x548] ss:$16 sps:$4 sm:$0xff]  }
 0x330   :  { %2343 = vmatpush2.bf16.msra.mxu0 %v3517_v50  ;;  %v3604_v50 = vld [vmem:[#allocation5 + $0x748] ss:$16 sps:$4 sm:$0xff]  }
 0x331   :  { %2384 = vmatpush2.bf16.msra.mxu1 %v3520_v51  ;;  %2394 = vmatprep.subr.bf16.mxu0 %v3525_v52  ;;  %v3609_v51 = vld [vmem:[#allocation5 + $0x52c] ss:$16 sps:$4 sm:$0xff]  }
 0x332   :  { %2435 = vmatprep.subr.bf16.mxu1 %v3528_v53  ;;  %v3612_v52 = vld [vmem:[#allocation5 + $0x72c] ss:$16 sps:$4 sm:$0xff]   ;;  %v3607_v53 = vld [vmem:[#allocation5 + $0x528] ss:$16 sps:$4 sm:$0xff]  }
 0x333   :  { %2345 = vmatmul.mubr.bf16.vlgmr.msra.gmra.mxu0 %v3919_v2  ;;  %v3538_v2 = vld [vmem:[#allocation5 + $0x6a8] ss:$16 sps:$4 sm:$0xff]  }
 0x334   :  { %2386 = vmatmul.mubr.bf16.vlgmr.msra.gmra.mxu1 %v3921_v3  ;;  %2395 = vmatpush1.bf16.msra.mxu0 %v3523_v54  ;;  %v3546_v3 = vld [vmem:[#allocation5 + $0x68c] ss:$16 sps:$4 sm:$0xff]   ;;  %v3610_v54 = vld [vmem:[#allocation5 + $0x728] ss:$16 sps:$4 sm:$0xff]  }
 0x335   :  { %2426 = vmatprep.mubr.bf16.mxu0 %v3931_v25  ;;  %2436 = vmatpush1.bf16.msra.mxu1 %v3526_v55  ;;  %v3544_v25 = vld [vmem:[#allocation5 + $0x688] ss:$16 sps:$4 sm:$0xff]   ;;  %v3615_v55 = vld [vmem:[#allocation5 + $0x50c] ss:$16 sps:$4 sm:$0xff]  }
 0x336   :  { %2467 = vmatprep.mubr.bf16.mxu1 %v3933_v26  ;;  %2396 = vmatprep.subr.bf16.mxu0 %v3531_v60  ;;  %v3547_v26 = vld [vmem:[#allocation5 + $0x468] ss:$16 sps:$4 sm:$0xff]   ;;  %v3618_v60 = vld [vmem:[#allocation5 + $0x70c] ss:$16 sps:$4 sm:$0xff]  }
 0x337   :  { %2437 = vmatprep.subr.bf16.mxu1 %v3534_v56  ;;  %v3613_v56 = vld [vmem:[#allocation5 + $0x508] ss:$16 sps:$4 sm:$0xff]  }
 0x338   :  { %2397 = vmatpush1.bf16.msra.mxu0 %v3529_v61  ;;  %v3616_v61 = vld [vmem:[#allocation5 + $0x708] ss:$16 sps:$4 sm:$0xff]  }
 0x339   :  { %2438 = vmatpush1.bf16.msra.mxu1 %v3532_v57  ;;  %2398 = vmatprep.subr.bf16.mxu0 %v3537_v58  ;;  %v3619_v57 = vld [vmem:[#allocation7 + $0x78] sm:$0xff]  }
 0x33a   :  { %2439 = vmatprep.subr.bf16.mxu1 %v3540_v59  ;;  %v3620_v58 = vld [vmem:[#allocation7 + $0x38] sm:$0xff]   ;;  %v3621_v59 = vld [vmem:[#allocation7 + $0x70] sm:$0xff]  }
 0x33c   :  { %2399 = vmatpush1.bf16.msra.mxu0 %v3535_v62 }
 0x33d   :  { %2440 = vmatpush1.bf16.msra.mxu1 %v3538_v2  ;;  %2400 = vmatprep.subr.bf16.mxu0 %v3543_v63  ;;  %v3622_v63 = vld [vmem:[#allocation7 + $0x30] sm:$0xff]  }
 0x33e   :  { %2441 = vmatprep.subr.bf16.mxu1 %v3546_v3 }
 0x340   :  { %2401 = vmatpush1.bf16.msra.mxu0 %v3541_v0 }
 0x341   :  { %2442 = vmatpush1.bf16.msra.mxu1 %v3544_v25  ;;  %2402 = vmatprep.subr.bf16.mxu0 %v3549_v1  ;;  %v3623_v25 = vld [vmem:[#allocation7 + $0x68] sm:$0xff]  }
 0x342   :  { %2443 = vmatprep.subr.bf16.mxu1 %v3552_v9 }
 0x344   :  { %2403 = vmatpush1.bf16.msra.mxu0 %v3547_v26  ;;  %v3624_v26 = vld [vmem:[#allocation7 + $0x28] sm:$0xff]  }
 0x345   :  { %2444 = vmatpush1.bf16.msra.mxu1 %v3550_v10  ;;  %2404 = vmatprep.subr.bf16.mxu0 %v3555_v11 }
 0x346   :  { %2445 = vmatprep.subr.bf16.mxu1 %v3558_v12  ;;  %v3625_v12 = vld [vmem:[#allocation7 + $0x60] sm:$0xff]  }
 0x348   :  { %2405 = vmatpush1.bf16.msra.mxu0 %v3553_v13  ;;  %v3635_v13 = vld [vmem:[#allocation7 + $0xf8] sm:$0xff]  }
 0x349   :  { %2446 = vmatpush1.bf16.msra.mxu1 %v3556_v14  ;;  %2406 = vmatprep.subr.bf16.mxu0 %v3561_v15  ;;  %v3637_v14 = vld [vmem:[#allocation7 + $0xf0] sm:$0xff]   ;;  %v3626_v15 = vld [vmem:[#allocation7 + $0x20] sm:$0xff]  }
 0x34a   :  { %2447 = vmatprep.subr.bf16.mxu1 %v3564_v16  ;;  %v3638_v16 = vld [vmem:[#allocation7 + $0xb0] sm:$0xff]  }
 0x34c   :  { %2407 = vmatpush1.bf16.msra.mxu0 %v3559_v17  ;;  %v3639_v17 = vld [vmem:[#allocation7 + $0xe8] sm:$0xff]  }
 0x34d   :  { %2448 = vmatpush1.bf16.msra.mxu1 %v3562_v18  ;;  %2408 = vmatprep.subr.bf16.mxu0 %v3567_v19  ;;  %v3628_v18 = vld [vmem:[#allocation7 + $0x18] sm:$0xff]   ;;  %v3629_v19 = vld [vmem:[#allocation7 + $0x50] sm:$0xff]  }
 0x34e   :  { %2449 = vmatprep.subr.bf16.mxu1 %v3570_v20  ;;  %v3640_v20 = vld [vmem:[#allocation7 + $0xa8] sm:$0xff]  }
 0x350   :  { %2409 = vmatpush1.bf16.msra.mxu0 %v3565_v21  ;;  %v3641_v21 = vld [vmem:[#allocation7 + $0xe0] sm:$0xff]  }
 0x351   :  { %2450 = vmatpush1.bf16.msra.mxu1 %v3568_v22  ;;  %2410 = vmatprep.subr.bf16.mxu0 %v3573_v23  ;;  %v3630_v22 = vld [vmem:[#allocation7 + $0x10] sm:$0xff]   ;;  %v3631_v23 = vld [vmem:[#allocation7 + $0x48] sm:$0xff]  }
 0x352   :  { %2451 = vmatprep.subr.bf16.mxu1 %v3576_v24  ;;  %v3642_v24 = vld [vmem:[#allocation7 + $0xa0] sm:$0xff]  }
 0x354   :  { %2411 = vmatpush2.bf16.msra.mxu0 %v3571_v27  ;;  %v3643_v27 = vld [vmem:[#allocation7 + $0xd8] sm:$0xff]  }
 0x355   :  { %2452 = vmatpush2.bf16.msra.mxu1 %v3574_v28  ;;  %2412 = vmatprep.subr.bf16.mxu0 %v3579_v29  ;;  %v3632_v28 = vld [vmem:[#allocation7 + $0x8] sm:$0xff]   ;;  %v3633_v29 = vld [vmem:[#allocation7 + $0x40] sm:$0xff]  }
 0x356   :  { %2453 = vmatprep.subr.bf16.mxu1 %v3582_v30  ;;  %v3644_v30 = vld [vmem:[#allocation7 + $0x98] sm:$0xff]  }
 0x358   :  { %2413 = vmatpush2.bf16.msra.mxu0 %v3577_v31  ;;  %v3634_v31 = vld [vmem:[#allocation7] sm:$0xff]  }
 0x359   :  { %2454 = vmatpush2.bf16.msra.mxu1 %v3580_v32  ;;  %2414 = vmatprep.subr.bf16.mxu0 %v3585_v34  ;;  %v846_v32 = vld [vmem:[%s3977_s8] sm:$0xf]  ;;  %s3772_s8 = smov [#allocation10]  }
 0x35a   :  { %2455 = vmatprep.subr.bf16.mxu1 %v3588_v35  ;;  %v851_v34 = vrot.slane %v846_v32, %v3860_v8  ;;  %v855_v35 = vrot.slane %v846_v32, %v3857_v7  ;;  %v3647_v8 = vld [vmem:[#allocation7 + $0xc8] sm:$0xff]   ;;  %s2834_s29 = sshll.u32 %s3772_s8, 4  ;;  %s2835_s29 = int_to_ptr.vmem [resolvable:$true] %s2834_s29 }
 0x35b   :  { %v3648_v7 = vld [vmem:[#allocation7 + $0x88] sm:$0xff]   ;;  %s3731_s30 = scalar_lea.vmem %s2835_s29, 32  ;;  %p3736_p7 = scmp.lt.s32.totalorder %s2835_s29, %s2835_s29 }
 0x35c   :  { %2415 = vmatpush2.bf16.msra.mxu0 %v3583_v39  ;;  %p3732_p6 = scmp.ne.s32.totalorder %s2835_s29, %s3731_s30  ;;  %p3737_p8 = scmp.lt.s32.totalorder %s3731_s30, %s3731_s30 }
 0x35d   :  { %2456 = vmatpush2.bf16.msra.mxu1 %v3586_v37  ;;  %2416 = vmatprep.subr.bf16.mxu0 %v3591_v33 }
 0x35e   :  { %2457 = vmatprep.subr.bf16.mxu1 %v3594_v40  ;;  %p3738_p9 = por %p3737_p8, %p3736_p7 }
 0x360   :  { %2417 = vmatpush2.bf16.msra.mxu0 %v3589_v41  ;;  %p3739_p10 = pnand %p3738_p9, %p3732_p6 }
 0x361   :  { %2458 = vmatpush2.bf16.msra.mxu1 %v3592_v42  ;;  %2418 = vmatprep.subr.bf16.mxu0 %v3597_v43  ;;  %v3645_v42 = vld [vmem:[#allocation7 + $0xd0] sm:$0xff]  }
 0x362   :  { %2459 = vmatprep.subr.bf16.mxu1 %v3600_v44 }
 0x364   :  { %2419 = vmatpush2.bf16.msra.mxu0 %v3595_v45  ;;  %v3646_v45 = vld [vmem:[#allocation7 + $0x90] sm:$0xff]  }
 0x365   :  { %2460 = vmatpush2.bf16.msra.mxu1 %v3598_v46  ;;  %2420 = vmatprep.subr.bf16.mxu0 %v3603_v47 }
 0x366   :  { %2461 = vmatprep.subr.bf16.mxu1 %v3606_v48 }
 0x368   :  { %2421 = vmatpush2.bf16.msra.mxu0 %v3601_v49 }
 0x369   :  { %2462 = vmatpush2.bf16.msra.mxu1 %v3604_v50  ;;  %2422 = vmatprep.subr.bf16.mxu0 %v3609_v51 }
 0x36a   :  { %2463 = vmatprep.subr.bf16.mxu1 %v3612_v52 }
 0x36c   :  { %2423 = vmatpush2.bf16.msra.mxu0 %v3607_v53 }
 0x36d   :  { %2464 = vmatpush2.bf16.msra.mxu1 %v3610_v54  ;;  %2424 = vmatprep.subr.bf16.mxu0 %v3615_v55 }
 0x36e   :  { %2465 = vmatprep.subr.bf16.mxu1 %v3618_v60 }
 0x370   :  { %2425 = vmatpush2.bf16.msra.mxu0 %v3613_v56  ;;  %v3649_v56 = vld [vmem:[#allocation7 + $0xc0] sm:$0xff]  }
 0x371   :  { %2466 = vmatpush2.bf16.msra.mxu1 %v3616_v61  ;;  %3163 = vmatprep.subr.bf16.mxu0 %v3619_v57  ;;  %v3650_v57 = vld [vmem:[#allocation7 + $0x80] sm:$0xff]  }
 0x372   :  { %3185 = vmatprep.subr.bf16.mxu1 %v3635_v13 }
 0x373   :  { %2427 = vmatmul.mubr.bf16.vlgmr.msra.gmra.mxu0 %v3943_v4  ;;  %v2182_v62 = vpop.f32.mrf.mxu0  ;;  %v2223_v2 = vpop.f32.mrf.mxu1  ;;  %v3636_v4 = vld [vmem:[#allocation7 + $0xb8] sm:$0xff]  }
 0x374   :  { %2468 = vmatmul.mubr.bf16.vlgmr.msra.gmra.mxu1 %v3945_v5  ;;  %3164 = vmatpush3.bf16.msra.mxu0 %v3620_v58  ;;  %v3627_v5 = vld [vmem:[#allocation7 + $0x58] sm:$0xff]   ;;  %v2183_v39 = vadd.f32 %v2182_v62, %v851_v34 }
 0x375   :  { %v2184_v3 = vpop.f32.mrf.mxu0  ;;  %v2225_v0 = vpop.f32.mrf.mxu1  ;;  %3165 = vmatprep.subr.bf16.mxu0 %v3621_v59  ;;  %3186 = vmatpush3.bf16.msra.mxu1 %v3636_v4 }
 0x376   :  { %3187 = vmatprep.subr.bf16.mxu1 %v3637_v14  ;;  %v2185_v37 = vadd.f32 %v2184_v3, %v855_v35  ;;  %v2224_v33 = vadd.f32 %v2223_v2, %v2183_v39 }
 0x377   :  { %v2186_v1 = vpop.f32.mrf.mxu0  ;;  %v2227_v9 = vpop.f32.mrf.mxu1 }
 0x378   :  { %3166 = vmatpush3.bf16.msra.mxu0 %v3622_v63  ;;  %v2226_v43 = vadd.f32 %v2225_v0, %v2185_v37  ;;  %v859_v9 = vrot.slane %v846_v32, %v290_v36 }
 0x379   :  { %v2187_v10 = vpop.f32.mrf.mxu0  ;;  %v2228_v11 = vpop.f32.mrf.mxu1  ;;  %3167 = vmatprep.subr.bf16.mxu0 %v3623_v25  ;;  %3188 = vmatpush3.bf16.msra.mxu1 %v3638_v16 }
 0x37a   :  { %3189 = vmatprep.subr.bf16.mxu1 %v3639_v17 }
 0x37c   :  { %3168 = vmatpush3.bf16.msra.mxu0 %v3624_v26  ;;  %v863_v26 = vrot.slane %v846_v32, %v294_v38  ;;  %v3126_v32 = vld [vmem:[#allocation8] ss:$0 sm:$0xff] }
 0x37d   :  { %3169 = vmatprep.subr.bf16.mxu0 %v3625_v12  ;;  %3190 = vmatpush3.bf16.msra.mxu1 %v3640_v20 }
 0x37e   :  { %3191 = vmatprep.subr.bf16.mxu1 %v3641_v21 }
 0x380   :  { %3170 = vmatpush3.bf16.msra.mxu0 %v3626_v15 }
 0x381   :  { %3171 = vmatprep.subr.bf16.mxu0 %v3627_v5  ;;  %3192 = vmatpush3.bf16.msra.mxu1 %v3642_v24 }
 0x382   :  { %3193 = vmatprep.subr.bf16.mxu1 %v3643_v27 }
 0x384   :  { %3172 = vmatpush3.bf16.msra.mxu0 %v3628_v18 }
 0x385   :  { %3173 = vmatprep.subr.bf16.mxu0 %v3629_v19  ;;  %3194 = vmatpush3.bf16.msra.mxu1 %v3644_v30 }
 0x386   :  { %3195 = vmatprep.subr.bf16.mxu1 %v3645_v42 }
 0x388   :  { %3174 = vmatpush3.bf16.msra.mxu0 %v3630_v22 }
 0x389   :  { %3175 = vmatprep.subr.bf16.mxu0 %v3631_v23  ;;  %3196 = vmatpush3.bf16.msra.mxu1 %v3646_v45 }
 0x38a   :  { %3197 = vmatprep.subr.bf16.mxu1 %v3647_v8 }
 0x38c   :  { %3176 = vmatpush3.bf16.msra.mxu0 %v3632_v28 }
 0x38d   :  { %3177 = vmatprep.subr.bf16.mxu0 %v3633_v29  ;;  %3198 = vmatpush3.bf16.msra.mxu1 %v3648_v7 }
 0x38e   :  { %3199 = vmatprep.subr.bf16.mxu1 %v3649_v56 }
 0x390   :  { %3178 = vmatpush3.bf16.msra.mxu0 %v3634_v31 }
 0x391   :  { %3200 = vmatpush3.bf16.msra.mxu1 %v3650_v57 }
 0x3b3   :  { %v2264_v40 = vpop.f32.mrf.mxu0  ;;  %v2305_v41 = vpop.f32.mrf.mxu1 }
 0x3b4   :  { %v2265_v44 = vadd.f32 %v2264_v40, %v2224_v33 }
 0x3b5   :  { %v2266_v46 = vpop.f32.mrf.mxu0  ;;  %v2307_v47 = vpop.f32.mrf.mxu1 }
 0x3b6   :  { %v2306_v48 = vadd.f32 %v2305_v41, %v2265_v44  ;;  %v2267_v49 = vadd.f32 %v2266_v46, %v2226_v43 }
 0x3b7   :  { %v2268_v50 = vpop.f32.mrf.mxu0  ;;  %v2309_v51 = vpop.f32.mrf.mxu1 }
 0x3b8   :  { %v2308_v52 = vadd.f32 %v2307_v47, %v2267_v49  ;;  %v2476_v53 = vmax.f32 %v2306_v48, 0.0 }
 0x3b9   :  { %v2269_v54 = vpop.f32.mrf.mxu0  ;;  %v2310_v55 = vpop.f32.mrf.mxu1 }
 0x3ba   :  { %v2477_v60 = vmax.f32 %v2308_v52, 0.0  ;;  %v2480_v58 = vpack.c.bf16 %v2476_v53, %v2476_v53 }
 0x3bc   :  { %v2481_v61 = vpack.c.bf16 %v2477_v60, %v2477_v60 }
 0x3be   :  { %2779 = vmatprep.mubr.bf16.mxu0 %v2481_v61 }
 0x3bf   :  { %2780 = vmatmul.mubr.bf16.vlgmr.msra.gmra.mxu0 %v2480_v58 }
 0x3f3   :  { %v2346_v59 = vpop.f32.mrf.mxu0 }
 0x3f4   :  { %v2387_v62 = vpop.f32.mrf.mxu1  ;;  %v2347_v10 = vadd.f32 %v2346_v59, %v859_v9 }
 0x3f5   :  { %v2348_v2 = vpop.f32.mrf.mxu0 }
 0x3f6   :  { %v2389_v63 = vpop.f32.mrf.mxu1  ;;  %v2349_v11 = vadd.f32 %v2348_v2, %v863_v26  ;;  %v2388_v12 = vadd.f32 %v2387_v62, %v2347_v10 }
 0x3f7   :  { %v2350_v3 = vpop.f32.mrf.mxu0 }
 0x3f8   :  { %v2391_v0 = vpop.f32.mrf.mxu1  ;;  %v2390_v4 = vadd.f32 %v2389_v63, %v2349_v11 }
 0x3f9   :  { %v2351_v25 = vpop.f32.mrf.mxu0 }
 0x3fa   :  { %v2392_v1 = vpop.f32.mrf.mxu1 }
 0x433   :  { %v2428_v13 = vpop.f32.mrf.mxu0 }
 0x434   :  { %v2429_v14 = vadd.f32 %v2428_v13, %v2388_v12  ;;  %v2469_v15 = vpop.f32.mrf.mxu1 }
 0x435   :  { %v2430_v5 = vpop.f32.mrf.mxu0 }
 0x436   :  { %v2470_v16 = vadd.f32 %v2469_v15, %v2429_v14  ;;  %v2431_v17 = vadd.f32 %v2430_v5, %v2390_v4  ;;  %v2471_v18 = vpop.f32.mrf.mxu1 }
 0x437   :  { %v2432_v19 = vpop.f32.mrf.mxu0 }
 0x438   :  { %v2472_v20 = vadd.f32 %v2471_v18, %v2431_v17  ;;  %v2473_v21 = vpop.f32.mrf.mxu1  ;;  %v2478_v22 = vmax.f32 %v2470_v16, 0.0 }
 0x439   :  { %v2433_v23 = vpop.f32.mrf.mxu0 }
 0x43a   :  { %v2479_v36 = vmax.f32 %v2472_v20, 0.0  ;;  %v2474_v24 = vpop.f32.mrf.mxu1  ;;  %v2482_v38 = vpack.c.bf16 %v2478_v22, %v2478_v22 }
 0x43c   :  { %v2483_v6 = vpack.c.bf16 %v2479_v36, %v2479_v36 }
 0x43e   :  { %2819 = vmatprep.mubr.bf16.mxu1 %v2483_v6 }
 0x43f   :  { %2820 = vmatmul.mubr.bf16.vlgmr.msra.gmra.mxu1 %v2482_v38 }
 0x47f   :  { %v3179_v27 = vpop.f32.mrf.mxu0 }
 0x481   :  { %v3180_v28 = vpop.f32.mrf.mxu0 }
 0x482   :  { %v3181_v29 = vadd.f32 %v3180_v28, %v3179_v27 }
 0x483   :  { %v3182_v30 = vpop.f32.mrf.mxu0 }
 0x484   :  { %v2782_v39 = vadd.f32 %v3181_v29, %v3126_v32 }
 0x485   :  { %v3183_v31 = vpop.f32.mrf.mxu0 }
 0x4ff   :  { %v3201_v34 = vpop.f32.mrf.mxu1 }
 0x501   :  { %v3202_v35 = vpop.f32.mrf.mxu1 }
 0x502   :  { %v3203_v37 = vadd.f32 %v3202_v35, %v3201_v34 }
 0x503   :  { %v3204_v33 = vpop.f32.mrf.mxu1 }
 0x504   :  { %v2822_v40 = vadd.f32 %v3203_v37, %v2782_v39 }
 0x505   :  { %v3205_v41 = vpop.f32.mrf.mxu1 }
 0x506   :  { %2827 = vst [vmem:[#allocation10] sm:$0x3] %v2822_v40 }
 0x507   :  { %3742 = shalt.err (!%p3739_p10)
}
 0x508   :  { %2837 = dma.vmem_to_hbm [thread:$0]  %s2835_s29, 32, %s3980_s11, [#allocation4]  }
 0x509   :  { %3757 = dma.done.wait [#allocation4], 32  }
 0x50a   :  { %3758 = vsyncadd [#allocation4], 4294967264 }
 0x50b   :  { %2841 = vsyncpa [#allocation3], 1 }
 0x50c   :  { %2842 = vsyncpa [#allocation6], 1 }
 0x50d   :  { %2843 = vsyncpa [#allocation9], 1 }
 0x50e   :  { %2844 = vsyncpa [#allocation4], 1 }

</bundles_post_ra>
